<compile_context>
chip_gen: v6e
topology: v6e:2x2x1
jax: 0.10.0
libtpu: 0.0.40
codegen_flags: <defaults>
</compile_context>

<pallas_src>
import functools

import jax
import jax.numpy as jnp
from jax.experimental import pallas as pl
from jax.experimental.pallas import tpu as pltpu


def autopad(k, p=None, d=1):
    """Pad to 'same' shape outputs (mirrors the PyTorch helper)."""
    if d > 1:
        k = d * (k - 1) + 1 if isinstance(k, int) else [d * (x - 1) + 1 for x in k]
    if p is None:
        p = k // 2 if isinstance(k, int) else [x // 2 for x in k]
    return p


def _pick_tile(n, target):
    """Largest divisor of n that is <= target (and >= 1)."""
    target = max(1, min(target, n))
    for t in range(target, 0, -1):
        if n % t == 0:
            return t
    return 1


def _conv_bn_silu_kernel(x_ref, w_ref, b_ref, o_ref, slab_ref, *, K, D, TH, W):
    """One grid step: one (TH, W, TC) output tile for one batch element.

    x_ref:    (TH + (K-1)*D, Wp, Cin)  bf16 halo'd input rows for this H-tile
    w_ref:    (K*K*Cin, TC)            bf16 BN-scale-folded weights (Cout tile)
    b_ref:    (1, TC)                  f32 fused BN bias
    o_ref:    (TH, W, TC)              f32 output tile (lane-dense, TC=128)
    slab_ref: (TH*W, K*K*Cin)          bf16 VMEM scratch: folded im2col operand
    """
    Cin = x_ref.shape[-1]
    TC = o_ref.shape[-1]

    # Build the folded im2col slab once: each tap writes its shifted patch into
    # its own lane range of the scratch slab (no per-tap matmul, no K^2 acc passes).
    for kh in range(K):
        for kw in range(K):
            t = kh * K + kw
            piece = x_ref[kh * D:kh * D + TH, kw * D:kw * D + W, :]   # (TH, W, Cin)
            slab_ref[:, t * Cin:(t + 1) * Cin] = piece.reshape(TH * W, Cin)

    # Single long-contraction MXU matmul: (TH*W, K*K*Cin) @ (K*K*Cin, TC) -> f32.
    acc = jnp.dot(slab_ref[...], w_ref[...], preferred_element_type=jnp.float32)

    # BN scale already folded into the weights; epilogue is bias + SiLU.
    y = acc + b_ref[...]
    y = y * jax.nn.sigmoid(y)
    o_ref[...] = y.reshape(TH, W, TC).astype(o_ref.dtype)


def conv_bn_silu(x_nchw, w_oihw, gamma, beta, run_mean, run_var,
                 *, k=3, s=1, p=None, g=1, d=1, eps=1e-5):
    """Forward pass of `Conv` (conv -> BN(eval) -> SiLU) via a Pallas kernel.

    x_nchw: (N, Cin, H, W) float32, NCHW like PyTorch.
    w_oihw: (Cout, Cin, K, K) float32 conv weight (bias=False).
    Returns (N, Cout, Ho, Wo) float32.
    """
    assert s == 1, "stride != 1 not implemented in this kernel"
    assert g == 1, "groups != 1 not implemented in this kernel"
    # TODO(synk): grouped conv and stride>1 variants are not needed for the
    # default Conv(c1, c2, k) config and are left unimplemented.

    pad = autopad(k, p, d)
    N, Cin, H, W = x_nchw.shape
    Cout = w_oihw.shape[0]
    span = d * (k - 1)                 # receptive-field extent - 1
    Ho = H + 2 * pad - span            # stride-1 conv output size (matches PyTorch)
    Wo = W + 2 * pad - span
    Wp = W + 2 * pad

    # Tile sizes: TH*Wo ~ 128 MXU rows; Cout padded/tiled to 128 lanes (lane-dense
    # stores, and 128-wide tiles also suit v5e's 128-wide MXU).
    TC = 128
    TH = _pick_tile(Ho, max(1, 128 // max(Wo, 1)))
    halo = TH + span
    n_ht = Ho // TH
    Cout_p = ((Cout + TC - 1) // TC) * TC
    n_ct = Cout_p // TC

    # ---- wrapper glue (plain JAX): layout, padding, halo tiling, BN folding ----
    x_nhwc = jnp.transpose(x_nchw, (0, 2, 3, 1)).astype(jnp.bfloat16)
    x_pad = jnp.pad(x_nhwc, ((0, 0), (pad, pad), (pad, pad), (0, 0)))
    # Halo-duplicated H tiles -> plain Blocked specs, bounded VMEM per step.
    # TODO(synk): in production keep NHWC end-to-end and express the halo with a
    # pl.Element / manual-DMA index map instead of materializing duplicated rows.
    x_tiles = jnp.stack(
        [x_pad[:, ht * TH:ht * TH + halo, :, :] for ht in range(n_ht)], axis=1)
    # x_tiles: (N, n_ht, halo, Wp, Cin), bf16

    # Weights: (Cout, Cin, K, K) -> (K, K, Cin, Cout) -> (K*K*Cin, Cout);
    # fold BN scale into the weights; pad Cout to a lane-dense multiple of 128.
    scale = gamma / jnp.sqrt(run_var + eps)
    w_folded = jnp.transpose(w_oihw, (2, 3, 1, 0)).reshape(k * k * Cin, Cout)
    w_folded = (w_folded * scale[None, :]).astype(jnp.bfloat16)
    w_folded = jnp.pad(w_folded, ((0, 0), (0, Cout_p - Cout)))
    bias = (beta - run_mean * scale).astype(jnp.float32)
    bias = jnp.pad(bias, (0, Cout_p - Cout)).reshape(1, Cout_p)

    kernel = functools.partial(_conv_bn_silu_kernel, K=k, D=d, TH=TH, W=Wo)

    out_nhwc = pl.pallas_call(
        kernel,
        out_shape=jax.ShapeDtypeStruct((N, Ho, Wo, Cout_p), jnp.float32),
        grid_spec=pltpu.PrefetchScalarGridSpec(
            num_scalar_prefetch=0,
            # h-tile innermost: weight/bias blocks (indexed by ct only) stay resident.
            grid=(N, n_ct, n_ht),
            in_specs=[
                pl.BlockSpec((None, None, halo, Wp, Cin),
                             lambda n, ct, ht: (n, ht, 0, 0, 0)),
                pl.BlockSpec((k * k * Cin, TC), lambda n, ct, ht: (0, ct)),
                pl.BlockSpec((1, TC), lambda n, ct, ht: (0, ct)),
            ],
            out_specs=pl.BlockSpec((None, TH, Wo, TC),
                                   lambda n, ct, ht: (n, ht, 0, ct)),
            scratch_shapes=[pltpu.VMEM((TH * Wo, k * k * Cin), jnp.bfloat16)],
        ),
        compiler_params=pltpu.CompilerParams(
            dimension_semantics=("parallel", "parallel", "parallel"),
            vmem_limit_bytes=48 * 1024 * 1024,
        ),
    )(x_tiles, w_folded, bias)

    return jnp.transpose(out_nhwc[..., :Cout], (0, 3, 1, 2))


def _reference(x_nchw, w_oihw, gamma, beta, run_mean, run_var, *, pad, d, eps=1e-5):
    """Pure-JAX reference (lax conv) for a sanity check."""
    y = jax.lax.conv_general_dilated(
        x_nchw, w_oihw,
        window_strides=(1, 1),
        padding=[(pad, pad), (pad, pad)],
        rhs_dilation=(d, d),
        dimension_numbers=("NCHW", "OIHW", "NCHW"),
    )
    scale = (gamma / jnp.sqrt(run_var + eps)).reshape(1, -1, 1, 1)
    bias = (beta - run_mean * gamma / jnp.sqrt(run_var + eps)).reshape(1, -1, 1, 1)
    y = y * scale + bias
    return y * jax.nn.sigmoid(y)


if __name__ == "__main__":
    # Small, deterministic config: Conv(c1=4, c2=8, k=3) -> stride 1, 'same' pad.
    N, C1, H, W = 2, 4, 16, 16
    C2, K, S, D = 8, 3, 1, 1

    key = jax.random.PRNGKey(0)
    kx, kw, kg, kb, km, kv = jax.random.split(key, 6)

    x = jax.random.normal(kx, (N, C1, H, W), jnp.float32)
    w = jax.random.normal(kw, (C2, C1, K, K), jnp.float32) * 0.1
    gamma = 1.0 + 0.1 * jax.random.normal(kg, (C2,), jnp.float32)
    beta = 0.1 * jax.random.normal(kb, (C2,), jnp.float32)
    run_mean = 0.1 * jax.random.normal(km, (C2,), jnp.float32)
    run_var = jnp.abs(jax.random.normal(kv, (C2,), jnp.float32)) + 0.5

    out = conv_bn_silu(x, w, gamma, beta, run_mean, run_var, k=K, s=S, d=D)
    out = jax.block_until_ready(out)

    ref = _reference(x, w, gamma, beta, run_mean, run_var,
                     pad=autopad(K, None, D), d=D)
    assert out.shape == (N, C2, H, W), out.shape
    # bf16 inputs/weights with f32 accumulation: loosened tolerance vs f32 reference.
    err = float(jnp.max(jnp.abs(out - ref)))
    assert err < 5e-2, err

    print("KERNEL_OK")
</pallas_src>

<mosaic_0001>
module attributes {stable_mosaic.version = 11 : i64} {
  func.func @_conv_bn_silu_kernel(%arg0: i32, %arg1: i32, %arg2: i32, %arg3: memref<1x1x10x18x4xbf16, #tpu.memory_space<vmem>>, %arg4: memref<36x128xbf16, #tpu.memory_space<vmem>>, %arg5: memref<1x128xf32, #tpu.memory_space<vmem>>, %arg6: memref<1x8x16x128xf32, #tpu.memory_space<vmem>>, %arg7: memref<128x36xbf16, #tpu.memory_space<vmem>>) attributes {dimension_semantics = [#tpu.dimension_semantics<parallel>, #tpu.dimension_semantics<parallel>, #tpu.dimension_semantics<parallel>], iteration_bounds = array<i64: 2, 1, 2>, scalar_prefetch = 0 : i64, scratch_operands = 1 : i64, tpu.core_type = #tpu.core_type<tc>, window_params = [{transform_indices = @transform_0, window_bounds = array<i64: 1, 1, 10, 18, 4>}, {transform_indices = @transform_1, window_bounds = array<i64: 36, 128>}, {transform_indices = @transform_2, window_bounds = array<i64: 1, 128>}, {transform_indices = @transform_3, window_bounds = array<i64: 1, 8, 16, 128>}]} {
    %c0 = arith.constant 0 : index
    %c0_0 = arith.constant 0 : index
    %c0_1 = arith.constant 0 : index
    %c0_2 = arith.constant 0 : index
    %c0_3 = arith.constant 0 : index
    %0 = vector.load %arg3[%c0, %c0_0, %c0_1, %c0_2, %c0_3] : memref<1x1x10x18x4xbf16, #tpu.memory_space<vmem>>, vector<1x1x8x16x4xbf16>
    %1 = vector.shape_cast %0 : vector<1x1x8x16x4xbf16> to vector<8x16x4xbf16>
    %2 = vector.shape_cast %1 : vector<8x16x4xbf16> to vector<128x4xbf16>
    %c0_4 = arith.constant 0 : index
    %c0_5 = arith.constant 0 : index
    %3 = vector.load %arg7[%c0_4, %c0_5] : memref<128x36xbf16, #tpu.memory_space<vmem>>, vector<128x4xbf16>
    tpu.vector_store %arg7[%c0_4, %c0_5], %2 {strides = array<i32>} : memref<128x36xbf16, #tpu.memory_space<vmem>>, vector<128x4xbf16>,
    %c0_6 = arith.constant 0 : index
    %c0_7 = arith.constant 0 : index
    %c0_8 = arith.constant 0 : index
    %c1 = arith.constant 1 : index
    %c0_9 = arith.constant 0 : index
    %4 = vector.load %arg3[%c0_6, %c0_7, %c0_8, %c1, %c0_9] : memref<1x1x10x18x4xbf16, #tpu.memory_space<vmem>>, vector<1x1x8x16x4xbf16>
    %5 = vector.shape_cast %4 : vector<1x1x8x16x4xbf16> to vector<8x16x4xbf16>
    %6 = vector.shape_cast %5 : vector<8x16x4xbf16> to vector<128x4xbf16>
    %c0_10 = arith.constant 0 : index
    %c4 = arith.constant 4 : index
    %7 = vector.load %arg7[%c0_10, %c4] : memref<128x36xbf16, #tpu.memory_space<vmem>>, vector<128x4xbf16>
    tpu.vector_store %arg7[%c0_10, %c4], %6 {strides = array<i32>} : memref<128x36xbf16, #tpu.memory_space<vmem>>, vector<128x4xbf16>,
    %c0_11 = arith.constant 0 : index
    %c0_12 = arith.constant 0 : index
    %c0_13 = arith.constant 0 : index
    %c2 = arith.constant 2 : index
    %c0_14 = arith.constant 0 : index
    %8 = vector.load %arg3[%c0_11, %c0_12, %c0_13, %c2, %c0_14] : memref<1x1x10x18x4xbf16, #tpu.memory_space<vmem>>, vector<1x1x8x16x4xbf16>
    %9 = vector.shape_cast %8 : vector<1x1x8x16x4xbf16> to vector<8x16x4xbf16>
    %10 = vector.shape_cast %9 : vector<8x16x4xbf16> to vector<128x4xbf16>
    %c0_15 = arith.constant 0 : index
    %c8 = arith.constant 8 : index
    %11 = vector.load %arg7[%c0_15, %c8] : memref<128x36xbf16, #tpu.memory_space<vmem>>, vector<128x4xbf16>
    tpu.vector_store %arg7[%c0_15, %c8], %10 {strides = array<i32>} : memref<128x36xbf16, #tpu.memory_space<vmem>>, vector<128x4xbf16>,
    %c0_16 = arith.constant 0 : index
    %c0_17 = arith.constant 0 : index
    %c1_18 = arith.constant 1 : index
    %c0_19 = arith.constant 0 : index
    %c0_20 = arith.constant 0 : index
    %12 = vector.load %arg3[%c0_16, %c0_17, %c1_18, %c0_19, %c0_20] : memref<1x1x10x18x4xbf16, #tpu.memory_space<vmem>>, vector<1x1x8x16x4xbf16>
    %13 = vector.shape_cast %12 : vector<1x1x8x16x4xbf16> to vector<8x16x4xbf16>
    %14 = vector.shape_cast %13 : vector<8x16x4xbf16> to vector<128x4xbf16>
    %c0_21 = arith.constant 0 : index
    %c12 = arith.constant 12 : index
    %15 = vector.load %arg7[%c0_21, %c12] : memref<128x36xbf16, #tpu.memory_space<vmem>>, vector<128x4xbf16>
    tpu.vector_store %arg7[%c0_21, %c12], %14 {strides = array<i32>} : memref<128x36xbf16, #tpu.memory_space<vmem>>, vector<128x4xbf16>,
    %c0_22 = arith.constant 0 : index
    %c0_23 = arith.constant 0 : index
    %c1_24 = arith.constant 1 : index
    %c1_25 = arith.constant 1 : index
    %c0_26 = arith.constant 0 : index
    %16 = vector.load %arg3[%c0_22, %c0_23, %c1_24, %c1_25, %c0_26] : memref<1x1x10x18x4xbf16, #tpu.memory_space<vmem>>, vector<1x1x8x16x4xbf16>
    %17 = vector.shape_cast %16 : vector<1x1x8x16x4xbf16> to vector<8x16x4xbf16>
    %18 = vector.shape_cast %17 : vector<8x16x4xbf16> to vector<128x4xbf16>
    %c0_27 = arith.constant 0 : index
    %c16 = arith.constant 16 : index
    %19 = vector.load %arg7[%c0_27, %c16] : memref<128x36xbf16, #tpu.memory_space<vmem>>, vector<128x4xbf16>
    tpu.vector_store %arg7[%c0_27, %c16], %18 {strides = array<i32>} : memref<128x36xbf16, #tpu.memory_space<vmem>>, vector<128x4xbf16>,
    %c0_28 = arith.constant 0 : index
    %c0_29 = arith.constant 0 : index
    %c1_30 = arith.constant 1 : index
    %c2_31 = arith.constant 2 : index
    %c0_32 = arith.constant 0 : index
    %20 = vector.load %arg3[%c0_28, %c0_29, %c1_30, %c2_31, %c0_32] : memref<1x1x10x18x4xbf16, #tpu.memory_space<vmem>>, vector<1x1x8x16x4xbf16>
    %21 = vector.shape_cast %20 : vector<1x1x8x16x4xbf16> to vector<8x16x4xbf16>
    %22 = vector.shape_cast %21 : vector<8x16x4xbf16> to vector<128x4xbf16>
    %c0_33 = arith.constant 0 : index
    %c20 = arith.constant 20 : index
    %23 = vector.load %arg7[%c0_33, %c20] : memref<128x36xbf16, #tpu.memory_space<vmem>>, vector<128x4xbf16>
    tpu.vector_store %arg7[%c0_33, %c20], %22 {strides = array<i32>} : memref<128x36xbf16, #tpu.memory_space<vmem>>, vector<128x4xbf16>,
    %c0_34 = arith.constant 0 : index
    %c0_35 = arith.constant 0 : index
    %c2_36 = arith.constant 2 : index
    %c0_37 = arith.constant 0 : index
    %c0_38 = arith.constant 0 : index
    %24 = vector.load %arg3[%c0_34, %c0_35, %c2_36, %c0_37, %c0_38] : memref<1x1x10x18x4xbf16, #tpu.memory_space<vmem>>, vector<1x1x8x16x4xbf16>
    %25 = vector.shape_cast %24 : vector<1x1x8x16x4xbf16> to vector<8x16x4xbf16>
    %26 = vector.shape_cast %25 : vector<8x16x4xbf16> to vector<128x4xbf16>
    %c0_39 = arith.constant 0 : index
    %c24 = arith.constant 24 : index
    %27 = vector.load %arg7[%c0_39, %c24] : memref<128x36xbf16, #tpu.memory_space<vmem>>, vector<128x4xbf16>
    tpu.vector_store %arg7[%c0_39, %c24], %26 {strides = array<i32>} : memref<128x36xbf16, #tpu.memory_space<vmem>>, vector<128x4xbf16>,
    %c0_40 = arith.constant 0 : index
    %c0_41 = arith.constant 0 : index
    %c2_42 = arith.constant 2 : index
    %c1_43 = arith.constant 1 : index
    %c0_44 = arith.constant 0 : index
    %28 = vector.load %arg3[%c0_40, %c0_41, %c2_42, %c1_43, %c0_44] : memref<1x1x10x18x4xbf16, #tpu.memory_space<vmem>>, vector<1x1x8x16x4xbf16>
    %29 = vector.shape_cast %28 : vector<1x1x8x16x4xbf16> to vector<8x16x4xbf16>
    %30 = vector.shape_cast %29 : vector<8x16x4xbf16> to vector<128x4xbf16>
    %c0_45 = arith.constant 0 : index
    %c28 = arith.constant 28 : index
    %31 = vector.load %arg7[%c0_45, %c28] : memref<128x36xbf16, #tpu.memory_space<vmem>>, vector<128x4xbf16>
    tpu.vector_store %arg7[%c0_45, %c28], %30 {strides = array<i32>} : memref<128x36xbf16, #tpu.memory_space<vmem>>, vector<128x4xbf16>,
    %c0_46 = arith.constant 0 : index
    %c0_47 = arith.constant 0 : index
    %c2_48 = arith.constant 2 : index
    %c2_49 = arith.constant 2 : index
    %c0_50 = arith.constant 0 : index
    %32 = vector.load %arg3[%c0_46, %c0_47, %c2_48, %c2_49, %c0_50] : memref<1x1x10x18x4xbf16, #tpu.memory_space<vmem>>, vector<1x1x8x16x4xbf16>
    %33 = vector.shape_cast %32 : vector<1x1x8x16x4xbf16> to vector<8x16x4xbf16>
    %34 = vector.shape_cast %33 : vector<8x16x4xbf16> to vector<128x4xbf16>
    %c0_51 = arith.constant 0 : index
    %c32 = arith.constant 32 : index
    %35 = vector.load %arg7[%c0_51, %c32] : memref<128x36xbf16, #tpu.memory_space<vmem>>, vector<128x4xbf16>
    tpu.vector_store %arg7[%c0_51, %c32], %34 {strides = array<i32>} : memref<128x36xbf16, #tpu.memory_space<vmem>>, vector<128x4xbf16>,
    %c0_52 = arith.constant 0 : index
    %c0_53 = arith.constant 0 : index
    %36 = vector.load %arg7[%c0_52, %c0_53] : memref<128x36xbf16, #tpu.memory_space<vmem>>, vector<128x36xbf16>
    %c0_54 = arith.constant 0 : index
    %c0_55 = arith.constant 0 : index
    %37 = vector.load %arg4[%c0_54, %c0_55] : memref<36x128xbf16, #tpu.memory_space<vmem>>, vector<36x128xbf16>
    %cst = arith.constant dense<0.000000e+00> : vector<128x128xf32>
    %38 = tpu.matmul %36, %37, %cst {dimension_numbers = #tpu.dot_dimension_numbers<[1], [0], [0], [1], [0, 0, 1, 1], [], []>} : vector<128x36xbf16>, vector<36x128xbf16>, vector<128x128xf32> -> vector<128x128xf32>
    %c0_56 = arith.constant 0 : index
    %c0_57 = arith.constant 0 : index
    %39 = vector.load %arg5[%c0_56, %c0_57] : memref<1x128xf32, #tpu.memory_space<vmem>>, vector<1x128xf32>
    %40 = vector.broadcast %39 : vector<1x128xf32> to vector<128x128xf32>
    %41 = arith.addf %38, %40 : vector<128x128xf32>
    %42 = arith.negf %41 : vector<128x128xf32>
    %43 = math.exp %42 : vector<128x128xf32>
    %cst_58 = arith.constant 1.000000e+00 : f32
    %44 = vector.broadcast %cst_58 : f32 to vector<128x128xf32>
    %45 = arith.addf %44, %43 : vector<128x128xf32>
    %46 = arith.divf %44, %45 : vector<128x128xf32>
    %47 = arith.mulf %41, %46 : vector<128x128xf32>
    %48 = vector.shape_cast %47 : vector<128x128xf32> to vector<8x16x128xf32>
    %c0_59 = arith.constant 0 : index
    %c0_60 = arith.constant 0 : index
    %c0_61 = arith.constant 0 : index
    %c0_62 = arith.constant 0 : index
    %49 = vector.load %arg6[%c0_59, %c0_60, %c0_61, %c0_62] : memref<1x8x16x128xf32, #tpu.memory_space<vmem>>, vector<1x8x16x128xf32>
    %50 = vector.shape_cast %49 : vector<1x8x16x128xf32> to vector<8x16x128xf32>
    %51 = vector.shape_cast %48 : vector<8x16x128xf32> to vector<1x8x16x128xf32>
    tpu.vector_store %arg6[%c0_59, %c0_60, %c0_61, %c0_62], %51 {strides = array<i32>} : memref<1x8x16x128xf32, #tpu.memory_space<vmem>>, vector<1x8x16x128xf32>,
    return
  }
  func.func @transform_0(%arg0: i32, %arg1: i32, %arg2: i32) -> (i32, i32, i32, i32, i32) {
    %c0_i32 = arith.constant 0 : i32
    %c0_i32_0 = arith.constant 0 : i32
    %c0_i32_1 = arith.constant 0 : i32
    %c0_i32_2 = arith.constant 0 : i32
    return %arg0, %arg2, %c0_i32, %c0_i32_0, %c0_i32_1 : i32, i32, i32, i32, i32
  }
  func.func @transform_1(%arg0: i32, %arg1: i32, %arg2: i32) -> (i32, i32) {
    %c0_i32 = arith.constant 0 : i32
    %c0_i32_0 = arith.constant 0 : i32
    return %c0_i32, %arg1 : i32, i32
  }
  func.func @transform_2(%arg0: i32, %arg1: i32, %arg2: i32) -> (i32, i32) {
    %c0_i32 = arith.constant 0 : i32
    %c0_i32_0 = arith.constant 0 : i32
    return %c0_i32, %arg1 : i32, i32
  }
  func.func @transform_3(%arg0: i32, %arg1: i32, %arg2: i32) -> (i32, i32, i32, i32) {
    %c0_i32 = arith.constant 0 : i32
    %c0_i32_0 = arith.constant 0 : i32
    return %arg0, %arg2, %c0_i32, %arg1 : i32, i32, i32, i32
  }
}

</mosaic_0001>

<bundles_post_ra>
// kernel: tpu_custom_call.1
= control target key start
LH: loop header
LB: loop body
LE: loop exit
PB: predicated region body
PF: predicated region fallthrough
CT: control target
= control target key end

     0   :  { %8 = vsyncpa [#allocation4], 0  ;;  %s3783_s0 = inlined_call_operand.vmem [shape: bf16[2,2,10,18,4], index: 0, kind: input, shape index: {}]   ;;  %s3784_s1 = inlined_call_operand.vmem [shape: bf16[36,128], index: 1, kind: input, shape index: {}]   ;;  %s3785_s2 = inlined_call_operand.vmem [shape: f32[1,128], index: 2, kind: input, shape index: {}]   ;;  %s3786_s3 = inlined_call_operand.hbm [shape: f32[2,16,16,128], index: 3, kind: output, shape index: {}]  }
   0x1   :  { %10 = vsyncpa [#allocation4 + $0x1], 0  ;;  %s2822_s12 = smov 0   ;;  %s2824_s13 = smov 0  }
   0x2   :  { %s2826_s14 = smov 0   ;;  %s2828_s15 = smov 0  }
   0x3   :  { %s2830_s16 = smov 0   ;;  %s2832_s17 = smov 0  }
   0x4   :  { %s2834_s18 = smov 0   ;;  %s2836_s19 = smov 0  }
   0x5 LB: > { %s2295_s20 = sadd.s32 4294967295, %s2790_s19   ;;  %s2296_s21 = sadd.s32 4294967294, %s2790_s19   ;;  %s2790_s19 = sphi %s2836_s19, %s16_s19   ;;  %s2786_s18 = sphi %s2834_s18, %s3799_s18   ;;  %s2782_s17 = sphi %s2832_s17, %s3798_s17   ;;  %s2778_s16 = sphi %s2830_s16, %s3797_s16   ;;  %s2774_s15 = sphi %s2828_s15, %s3796_s15   ;;  %s2770_s14 = sphi %s2826_s14, %s3795_s14   ;;  %s2766_s13 = sphi %s2824_s13, %s3794_s13   ;;  %s2762_s12 = sphi %s2822_s12, %s3793_s12  }
   0x6   : > { %s28_s22 = sadd.s32 1, %s2782_s17  ;;  %s35_s23 = sadd.s32 1, %s2786_s18 }
   0x7   : > { %p29_p0 = scmp.ge.s32.totalorder %s28_s22, 2  ;;  %p136_p1 = scmp.ne.s32.totalorder %s2770_s14, %s2766_s13 }
   0x8   : > { %p137_p2 = scmp.eq.s32.totalorder %s2295_s20, 3  ;;  %p142_p5 = scmp.ne.s32.totalorder %s2766_s13, %s2762_s12 }
   0x9   : > { %s3801_s22 = smov (%p29_p0, %s28_s22), 0  ;;  %s3803_s23 = smov (!%p29_p0, %s35_s23), %s2786_s18 }
   0xa   : > { %s120_s24 = ssub.s32 %s2782_s17, %s3801_s22  ;;  %p2873_p3 = por %p137_p2, %p136_p1 }
   0xb   : > { %p37_p4 = scmp.ge.s32.totalorder %s3803_s23, 2  ;;  %p143_p6 = scmp.eq.s32.totalorder %s2296_s21, 3 }
   0xc   : > { %p2301_p7 = scmp.ge.s32.totalorder %s2790_s19, 1  ;;  %p186_p9 = scmp.lt.s32.totalorder %s2790_s19, 5 }
   0xd   : > { %s3805_s23 = smov (%p37_p4, %s3803_s23), 0  ;;  %p2882_p8 = por %p143_p6, %p142_p5 }
   0xe   : > { %s119_s27 = ssub.s32 %s2786_s18, %s3805_s23  ;;  %s126_s28 = sadd.s32 1, %s2770_s14 }
   0xf   : > { %s121_s29 = sor.u32 %s120_s24, %s119_s27  ;;  %p187_p10 = pnand %p2301_p7, %p186_p9 }
  0x10   : > { %p124_p11 = scmp.eq.s32.totalorder %s121_s29, 0  ;;  %p221_p12 = scmp.lt.s32.totalorder (!%p187_p10), %s2778_s16, 1 }
  0x11   : > { %190 = sbr.rel (%p187_p10) target bundleno = 663 (0x297), region = 32  ;;  %p223_p13 = scmp.lt.s32.totalorder (!%p187_p10), %s2774_s15, 1 }
  0x12   : > { %s2891_s30 = scalar_select %p124_p11, %s2770_s14, %s126_s28  }
  0x13   : > { %s2792_s21 = smov (!%p187_p10), 8   ;;  %s2793_s24 = smov (!%p187_p10), 4  }
  0x14   : > { %s2794_s27 = smov (!%p187_p10), 12   ;;  %s2795_s28 = smov (!%p187_p10), 16  }
  0x15   : > { %s2796_s29 = smov (!%p187_p10), 20  }
  0x16   : > { %s222_s4 = scalar_select %p221_p12, %s2778_s16, 1  ;;  %vm604_vm0 = vcmask 1042432   ;;  %vm605_vm1 = vcmask 1046532   ;;  %vm296_vm3 = vsmask.f32 3328  ;;  %vm255_vm6 = vcmask 27648  }
  0x17   : > { %s224_s5 = scalar_select %p223_p13, %s2774_s15, 1  ;;  %vm2902_vm2 = vmor %vm604_vm0, %vm605_vm1  ;;  %vm297_vm4 = vsmask.f32 7440  ;;  %vm539_vm7 = vcmask 60448   ;;  %vm711_vm8 = vcmask 93248   ;;  %vm1932_vm9 = vcmask 1041408  }
  0x18   : > { %s2542_s6 = smul.u32 60, %s222_s4  ;;  %vm2924_vm5 = vmor %vm296_vm3, %vm297_vm4  ;;  %s2797_s4 = smov 24   ;;  %vm809_vm10 = vcmask 126048   ;;  %vm1090_vm11 = vcmask 158848   ;;  %vm1259_vm12 = vcmask 191648   ;;  %vm1357_vm13 = vcmask 224448  }
  0x19   : > { %s2541_s7 = smul.u32 30, %s224_s5  ;;  %s2798_s5 = smov 28   ;;  %vm1638_vm14 = vcmask 257248   ;;  %vm1807_vm15 = vcmask 290048   ;;  %vm1907_vm0 = vcmask 293888  }
  0x1b   : > { %s227_s8 = sadd.s32 %s2542_s6, %s2541_s7  ;;  %s2799_s6 = smov 32  }
  0x1c   : > { %s2303_s9 = sshll.u32 %s227_s8, 2 }
  0x1d   : > { %s2900_s20 = scalar_lea.vmem %s3783_s0, %s2303_s9 }
  0x1e   : > { %v557_v1 = vld [vmem:[%s2900_s20 + $0x4] sm:$0xf]  ;;  %v558_v2 = vld [vmem:[%s2900_s20 + $0x8] sm:$0x1]  ;;  %v556_v3 = vld [vmem:[%s2900_s20] sm:$0xe] }
  0x1f   : > { %v609_v4 = vrot.slane %v557_v1, 5  ;;  %v612_v5 = vrot.slane %v558_v2, 5  ;;  %v2304_v6 = vrot.slane %v556_v3, 9  ;;  %v284_v7 = vld [vmem:[%s2900_s20 + $0x30] sm:$0xf] }
  0x20   : > { %v285_v8 = vld [vmem:[%s2900_s20 + $0x34] sm:$0xf]  ;;  %v396_v9 = vshrl.u32 %v284_v7, 16  ;;  %v399_v10 = vshll.u32 %v284_v7, 16  ;;  %v272_v11 = vld [vmem:[%s2900_s20] sm:$0xf] }
  0x21   : > { %v611_v12 = vrot.slane %v609_v4, 4  ;;  %v610_v13 = vsel %vm2902_vm2, %v2304_v6, %v609_v4  ;;  %v405_v14 = vshll.u32 %v285_v8, 16  ;;  %v409_v15 = vshrl.u32 %v285_v8, 16  ;;  %v273_v16 = vld [vmem:[%s2900_s20 + $0x4] sm:$0xf] }
  0x22   : > { %663 = vrot.lane.b32.xlu0 %v610_v13, %s2792_s21  ;;  %v398_v17 = vrot.slane %v396_v9, 4  ;;  %v401_v18 = vrot.slane %v399_v10, 5  ;;  %v300_v19 = vshrl.u32 %v272_v11, 16  ;;  %v303_v20 = vshll.u32 %v272_v11, 16  ;;  %v286_v21 = vld [vmem:[%s2900_s20 + $0x38] sm:$0x1] }
  0x23   : > { %v613_v22 = vsel %vm2902_vm2, %v611_v12, %v612_v5  ;;  %v407_v23 = vrot.slane %v405_v14, 5  ;;  %v309_v24 = vshll.u32 %v273_v16, 16  ;;  %v313_v25 = vshrl.u32 %v273_v16, 16  ;;  %v274_v26 = vld [vmem:[%s2900_s20 + $0x8] sm:$0x1] }
  0x24   : > { %665 = vrot.lane.b32.xlu1 %v613_v22, %s2792_s21  ;;  %v402_v27 = vor.u32 %v401_v18, %v398_v17  ;;  %v302_v28 = vrot.slane %v300_v19, 4  ;;  %v305_v29 = vrot.slane %v303_v20, 5  ;;  %v411_v30 = vrot.slane %v409_v15, 4  ;;  %v276_v31 = vld [vmem:[%s2900_s20 + $0x10] sm:$0xf] }
  0x25   : > { %v311_v33 = vrot.slane %v309_v24, 5  ;;  %v415_v34 = vshll.u32 %v286_v21, 16  ;;  %v315_v35 = vrot.slane %v313_v25, 4  ;;  %v319_v36 = vshll.u32 %v274_v26, 16  ;;  %v277_v40 = vld [vmem:[%s2900_s20 + $0x14] sm:$0x1] }
  0x26   : > { %v403_v37 = vrot.slane %v402_v27, 4  ;;  %v306_v38 = vor.u32 %v305_v29, %v302_v28  ;;  %v412_v39 = vor.u32 %v411_v30, %v407_v23  ;;  %v333_v41 = vshll.u32 %v276_v31, 16  ;;  %v275_v42 = vld [vmem:[%s2900_s20 + $0xc] sm:$0xf]  ;;  %v288_v47 = vld [vmem:[%s2900_s20 + $0x40] sm:$0xf] }
  0x27   : > { %v417_v43 = vrot.slane %v415_v34, 5  ;;  %v316_v44 = vor.u32 %v315_v35, %v311_v33  ;;  %v321_v45 = vrot.slane %v319_v36, 5  ;;  %v337_v46 = vshrl.u32 %v276_v31, 16  ;;  %v289_v56 = vld [vmem:[%s2900_s20 + $0x44] sm:$0x1] }
  0x28   : > { %v408_v48 = vsel %vm2924_vm5, %v403_v37, %v407_v23  ;;  %v307_v49 = vrot.slane %v306_v38, 4  ;;  %v413_v50 = vrot.slane %v412_v39, 4  ;;  %v335_v51 = vrot.slane %v333_v41, 5  ;;  %v287_v61 = vld [vmem:[%s2900_s20 + $0x3c] sm:$0xf] }
  0x29   : > { %507 = vrot.lane.b32.xlu1 %v408_v48, %s2793_s24  ;;  %v317_v52 = vrot.slane %v316_v44, 4  ;;  %v339_v53 = vrot.slane %v337_v46, 4  ;;  %v343_v54 = vshll.u32 %v277_v40, 16  ;;  %v324_v55 = vshrl.u32 %v275_v42, 16  ;;  %v569_v3 = vld [vmem:[%s2900_s20 + $0x34] sm:$0xf] }
  0x2a   : > { %v312_v57 = vsel %vm2924_vm5, %v307_v49, %v311_v33  ;;  %v418_v58 = vsel %vm2924_vm5, %v413_v50, %v417_v43  ;;  %v327_v59 = vshll.u32 %v275_v42, 16  ;;  %v429_v60 = vshll.u32 %v288_v47, 16  ;;  %v570_v13 = vld [vmem:[%s2900_s20 + $0x38] sm:$0x1]  ;;  %v560_v18 = vld [vmem:[%s2900_s20 + $0x10] sm:$0xf] }
  0x2b   : > { %491 = vrot.lane.b32.xlu0 %v312_v57, %s2793_s24  ;;  %v322_v62 = vsel %vm2924_vm5, %v317_v52, %v321_v45  ;;  %v340_v63 = vor.u32 %v339_v53, %v335_v51  ;;  %v345_v1 = vrot.slane %v343_v54, 5  ;;  %v326_v2 = vrot.slane %v324_v55, 4  ;;  %v568_v24 = vld [vmem:[%s2900_s20 + $0x30] sm:$0xe]  ;;  %v561_v30 = vld [vmem:[%s2900_s20 + $0x14] sm:$0x1] }
  0x2c   : > { %v329_v4 = vrot.slane %v327_v59, 5  ;;  %v431_v5 = vrot.slane %v429_v60, 5  ;;  %v433_v6 = vshrl.u32 %v288_v47, 16  ;;  %v439_v7 = vshll.u32 %v289_v56, 16  ;;  %v572_v31 = vld [vmem:[%s2900_s20 + $0x40] sm:$0xf] }
  0x2d   : > { %509 = vrot.lane.b32.xlu1 %v418_v58, %s2793_s24  ;;  %v341_v8 = vrot.slane %v340_v63, 4  ;;  %v420_v9 = vshrl.u32 %v287_v61, 16  ;;  %v423_v10 = vshll.u32 %v287_v61, 16  ;;  %v637_v14 = vrot.slane %v569_v3, 5  ;;  %v559_v36 = vld [vmem:[%s2900_s20 + $0xc] sm:$0xe] }
  0x2e   : > { %v330_v11 = vor.u32 %v329_v4, %v326_v2  ;;  %v435_v12 = vrot.slane %v433_v6, 4  ;;  %v441_v21 = vrot.slane %v439_v7, 5  ;;  %v640_v23 = vrot.slane %v570_v13, 5  ;;  %v573_v41 = vld [vmem:[%s2900_s20 + $0x44] sm:$0x1] }
  0x2f   : > { %493 = vrot.lane.b32.xlu0 %v322_v62, %s2793_s24  ;;  %v346_v15 = vsel %vm2924_vm5, %v341_v8, %v345_v1  ;;  %v422_v16 = vrot.slane %v420_v9, 4  ;;  %v425_v17 = vrot.slane %v423_v10, 5  ;;  %v639_v27 = vrot.slane %v637_v14, 4  ;;  %v571_v44 = vld [vmem:[%s2900_s20 + $0x3c] sm:$0xe] }
  0x30   : > { %v331_v19 = vrot.slane %v330_v11, 4  ;;  %v436_v20 = vor.u32 %v435_v12, %v431_v5  ;;  %v616_v28 = vrot.slane %v560_v18, 5  ;;  %v2308_v34 = vrot.slane %v568_v24, 9  ;;  %v2328_v53 = vld [vmem:[%s2900_s20 + $0xc] sm:$0xf] }
  0x31   : > { %497 = vrot.lane.b32.xlu1 %v346_v15, %s2793_s24  ;;  %v426_v22 = vor.u32 %v425_v17, %v422_v16  ;;  %v641_v37 = vsel %vm2902_vm2, %v639_v27, %v640_v23  ;;  %v619_v39 = vrot.slane %v561_v30, 5  ;;  %v644_v40 = vrot.slane %v572_v31, 5  ;;  %v2313_v56 = vld [vmem:[%s2900_s20 + $0x10] sm:$0xf]  ;;  %v2341_v57 = vld [vmem:[%s2900_s20 + $0x40] sm:$0xf] }
  0x32   : > { %v336_v25 = vsel %vm2924_vm5, %v331_v19, %v335_v51  ;;  %v437_v26 = vrot.slane %v436_v20, 4  ;;  %v618_v38 = vrot.slane %v616_v28, 4  ;;  %v638_v42 = vsel %vm2902_vm2, %v2308_v34, %v637_v14  ;;  %v2329_v51 = vld [vmem:[%s2900_s20 + $0x10] sm:$0xf]  ;;  %v2312_v60 = vld [vmem:[%s2900_s20 + $0xc] sm:$0xf] }
  0x33   : > { %495 = vrot.lane.b32.xlu0 %v336_v25, %s2793_s24  ;;  %v427_v29 = vrot.slane %v426_v22, 4  ;;  %v2305_v43 = vrot.slane %v559_v36, 9  ;;  %v646_v46 = vrot.slane %v644_v40, 4  ;;  %v647_v47 = vrot.slane %v573_v41, 5  ;;  %v2340_v61 = vld [vmem:[%s2900_s20 + $0x3c] sm:$0xf] }
  0x34   : > { %v442_v33 = vsel %vm2924_vm5, %v437_v26, %v441_v21  ;;  %v620_v45 = vsel %vm2902_vm2, %v618_v38, %v619_v39  ;;  %v2309_v49 = vrot.slane %v571_v44, 9  ;;  %v860_v54 = vshll.u32 %v2329_v51, 16  ;;  %v2321_v3 = vld [vmem:[%s2900_s20 + $0x40] sm:$0xf]  ;;  %v2330_v4 = vld [vmem:[%s2900_s20 + $0x14] sm:$0x1] }
  0x35   : > { %513 = vrot.lane.b32.xlu1 %v442_v33, %s2793_s24  ;;  %v432_v35 = vsel %vm2924_vm5, %v427_v29, %v431_v5  ;;  %v617_v48 = vsel %vm2902_vm2, %v2305_v43, %v616_v28  ;;  %v648_v50 = vsel %vm2902_vm2, %v646_v46, %v647_v47  ;;  %v864_v55 = vshrl.u32 %v2329_v51, 16  ;;  %v2332_v9 = vld [vmem:[%s2900_s20 + $0x1c] sm:$0xf]  ;;  %v2331_v15 = vld [vmem:[%s2900_s20 + $0x18] sm:$0xf] }
  0x36   : > { %v645_v52 = vsel %vm2902_vm2, %v2309_v49, %v644_v40  ;;  %v851_v58 = vshrl.u32 %v2328_v53, 16  ;;  %v854_v59 = vshll.u32 %v2328_v53, 16  ;;  %v2991_v62 = vrot.slane %v860_v54, 5  ;;  %v2320_v10 = vld [vmem:[%s2900_s20 + $0x3c] sm:$0xf] }
  0x37   : > { %511 = vrot.lane.b32.xlu0 %v432_v35, %s2793_s24  ;;  %v866_v63 = vrot.slane %v864_v55, 4  ;;  %v956_v1 = vshll.u32 %v2341_v57, 16  ;;  %v960_v2 = vshrl.u32 %v2341_v57, 16  ;;  %v947_v7 = vshrl.u32 %v2340_v61, 16  ;;  %v2315_v16 = vld [vmem:[%s2900_s20 + $0x1c] sm:$0xf] }
  0x38   : > { %v853_v5 = vrot.slane %v851_v58, 4  ;;  %v856_v6 = vrot.slane %v854_v59, 5  ;;  %v950_v8 = vshll.u32 %v2340_v61, 16  ;;  %v870_v12 = vshll.u32 %v2330_v4, 16  ;;  %v2342_v17 = vld [vmem:[%s2900_s20 + $0x44] sm:$0x1] }
  0x39   : > { %681 = vrot.lane.b32.xlu1 %v641_v37, %s2792_s21  ;;  %v867_v11 = vor.u32 %v866_v63, %v2991_v62  ;;  %v3000_v13 = vrot.slane %v956_v1, 5  ;;  %v962_v14 = vrot.slane %v960_v2, 4  ;;  %v884_v18 = vshll.u32 %v2332_v9, 16  ;;  %v2344_v23 = vld [vmem:[%s2900_s20 + $0x4c] sm:$0xf] }
  0x3a   : > { %v888_v19 = vshrl.u32 %v2332_v9, 16  ;;  %v857_v20 = vor.u32 %v856_v6, %v853_v5  ;;  %v949_v21 = vrot.slane %v947_v7, 4  ;;  %v952_v22 = vrot.slane %v950_v8, 5  ;;  %v2314_v24 = vld [vmem:[%s2900_s20 + $0x18] sm:$0xf] }
  0x3b   : > { %679 = vrot.lane.b32.xlu0 %v638_v42, %s2792_s21  ;;  %v2323_v25 = vld [vmem:[%s2900_s20 + $0x4c] sm:$0xf]  ;;  %v875_v26 = vshrl.u32 %v2331_v15, 16  ;;  %v878_v27 = vshll.u32 %v2331_v15, 16  ;;  %v868_v28 = vrot.slane %v867_v11, 4  ;;  %v872_v29 = vrot.slane %v870_v12, 5 }
  0x3c   : > { %v963_v30 = vor.u32 %v962_v14, %v3000_v13  ;;  %v966_v31 = vshll.u32 %v2342_v17, 16  ;;  %v2343_v33 = vld [vmem:[%s2900_s20 + $0x48] sm:$0xf]  ;;  %v2333_v34 = vld [vmem:[%s2900_s20 + $0x20] sm:$0x1]  ;;  %v886_v35 = vrot.slane %v884_v18, 5  ;;  %v953_v40 = vor.u32 %v952_v22, %v949_v21 }
  0x3d   : > { %669 = vrot.lane.b32.xlu1 %v620_v45, %s2792_s21  ;;  %v890_v36 = vrot.slane %v888_v19, 4  ;;  %v980_v37 = vshll.u32 %v2344_v23, 16  ;;  %v984_v38 = vshrl.u32 %v2344_v23, 16  ;;  %v858_v39 = vrot.slane %v857_v20, 4  ;;  %v2322_v41 = vld [vmem:[%s2900_s20 + $0x48] sm:$0xf] }
  0x3e   : > { %v877_v42 = vrot.slane %v875_v26, 4  ;;  %v880_v43 = vrot.slane %v878_v27, 5  ;;  %v971_v44 = vshrl.u32 %v2343_v33, 16  ;;  %v974_v45 = vshll.u32 %v2343_v33, 16  ;;  %v2345_v54 = vld [vmem:[%s2900_s20 + $0x50] sm:$0x1] }
  0x3f   : > { %667 = vrot.lane.b32.xlu0 %v617_v48, %s2792_s21  ;;  %v873_v46 = vsel %vm2924_vm5, %v868_v28, %v872_v29  ;;  %v968_v47 = vrot.slane %v966_v31, 5  ;;  %v894_v48 = vshll.u32 %v2333_v34, 16  ;;  %v964_v49 = vrot.slane %v963_v30, 4  ;;  %v2354_v9 = vld [vmem:[%s2900_s20 + $0x14] sm:$0x1] }
  0x40   : > { %v982_v51 = vrot.slane %v980_v37, 5  ;;  %v863_v53 = vsel %vm2924_vm5, %v858_v39, %v2991_v62  ;;  %v954_v55 = vrot.slane %v953_v40, 4  ;;  %v973_v57 = vrot.slane %v971_v44, 4  ;;  %v2353_v62 = vld [vmem:[%s2900_s20 + $0x10] sm:$0xf] }
  0x41   : > { %685 = vrot.lane.b32.xlu1 %v648_v50, %s2792_s21  ;;  %v891_v50 = vor.u32 %v890_v36, %v886_v35  ;;  %v976_v58 = vrot.slane %v974_v45, 5  ;;  %v896_v59 = vrot.slane %v894_v48, 5  ;;  %v990_v1 = vshll.u32 %v2345_v54, 16  ;;  %v2352_v14 = vld [vmem:[%s2900_s20 + $0xc] sm:$0xe] }
  0x42   : > { %v959_v2 = vsel %vm2924_vm5, %v954_v55, %v3000_v13  ;;  %v1157_v8 = vrot.slane %v2353_v62, 5  ;;  %v247_v13 = vld [vmem:[%s2900_s20 + $0x30] sm:$0xf]  ;;  %v239_v15 = vld [vmem:[%s2900_s20] sm:$0xf]  ;;  %v1160_v18 = vrot.slane %v2354_v9, 5 }
  0x43   : > { %683 = vrot.lane.b32.xlu0 %v645_v52, %s2792_s21  ;;  %v986_v52 = vrot.slane %v984_v38, 4  ;;  %v892_v61 = vrot.slane %v891_v50, 4  ;;  %v977_v4 = vor.u32 %v976_v58, %v973_v57  ;;  %v992_v7 = vrot.slane %v990_v1, 5  ;;  %264 = vst.msk [vmem:[#allocation2 + $0x20] sm:$0xf] %vm255_vm6, %v247_v13 }
  0x44   : > { %v1159_v17 = vrot.slane %v1157_v8, 4  ;;  %256 = vst.msk [vmem:[#allocation2] sm:$0xf] %vm255_vm6, %v239_v15  ;;  %v2366_v20 = vld [vmem:[%s2900_s20 + $0x44] sm:$0x1]  ;;  %v2376_v23 = vrot.slane %v2352_v14, 9 }
  0x45   : > { %763 = vrot.lane.b32.xlu1 %v2313_v56, %s2794_s27  ;;  %v881_v56 = vor.u32 %v880_v43, %v877_v42  ;;  %v987_v63 = vor.u32 %v986_v52, %v982_v51  ;;  %v897_v5 = vsel %vm2924_vm5, %v892_v61, %v896_v59  ;;  %v978_v12 = vrot.slane %v977_v4, 4  ;;  %v2356_v21 = vld [vmem:[%s2900_s20 + $0x1c] sm:$0xf]  ;;  %v2357_v31 = vld [vmem:[%s2900_s20 + $0x20] sm:$0x1] }
  0x46   : > { %v2364_v26 = vld [vmem:[%s2900_s20 + $0x3c] sm:$0xe]  ;;  %v1161_v27 = vsel %vm2902_vm2, %v1159_v17, %v1160_v18  ;;  %v1188_v29 = vrot.slane %v2366_v20, 5  ;;  %v1164_v30 = vrot.slane %v2356_v21, 5  ;;  %v2368_v33 = vld [vmem:[%s2900_s20 + $0x4c] sm:$0xf]  ;;  %v1158_v34 = vsel %vm2902_vm2, %v2376_v23, %v1157_v8 }
  0x47   : > { %761 = vrot.lane.b32.xlu0 %v2312_v60, %s2794_s27  ;;  %v969_v60 = vsel %vm2924_vm5, %v964_v49, %v968_v47  ;;  %v988_v6 = vrot.slane %v987_v63, 4  ;;  %v983_v22 = vsel %vm2924_vm5, %v978_v12, %v982_v51  ;;  %v242_v36 = vld [vmem:[%s2900_s20 + $0x10] sm:$0xf]  ;;  %v2355_v37 = vld [vmem:[%s2900_s20 + $0x18] sm:$0xe]  ;;  %v1192_v42 = vrot.slane %v2368_v33, 5 }
  0x48   : > { %259 = vst.msk [vmem:[#allocation2 + $0xc] sm:$0xf] %vm255_vm6, %v242_v36  ;;  %v241_v38 = vld [vmem:[%s2900_s20 + $0xc] sm:$0xf]  ;;  %v1166_v40 = vrot.slane %v1164_v30, 4  ;;  %v2377_v45 = vrot.slane %v2355_v37, 9 }
  0x49   : > { %779 = vrot.lane.b32.xlu1 %v2321_v3, %s2794_s27  ;;  %v882_v3 = vrot.slane %v881_v56, 4  ;;  %258 = vst.msk [vmem:[#allocation2 + $0x8] sm:$0xf] %vm255_vm6, %v241_v38  ;;  %v2369_v43 = vld [vmem:[%s2900_s20 + $0x50] sm:$0x1]  ;;  %v1194_v50 = vrot.slane %v1192_v42, 4 }
  0x4a   : > { %v2367_v47 = vld [vmem:[%s2900_s20 + $0x48] sm:$0xe]  ;;  %v249_v48 = vld [vmem:[%s2900_s20 + $0x3c] sm:$0xf]  ;;  %v1195_v51 = vrot.slane %v2369_v43, 5  ;;  %v1165_v52 = vsel %vm2902_vm2, %v2377_v45, %v1164_v30 }
  0x4b   : > { %777 = vrot.lane.b32.xlu0 %v2320_v10, %s2794_s27  ;;  %v2365_v10 = vld [vmem:[%s2900_s20 + $0x40] sm:$0xf]  ;;  %v887_v11 = vsel %vm2924_vm5, %v882_v3, %v886_v35  ;;  %v2380_v35 = vrot.slane %v2364_v26, 9  ;;  %266 = vst.msk [vmem:[#allocation2 + $0x28] sm:$0xf] %vm255_vm6, %v249_v48 }
  0x4c   : > { %v1185_v19 = vrot.slane %v2365_v10, 5  ;;  %v1196_v54 = vsel %vm2902_vm2, %v1194_v50, %v1195_v51  ;;  %v2401_v55 = vld [vmem:[%s2900_s20 + $0x1c] sm:$0xf]  ;;  %v2400_v57 = vld [vmem:[%s2900_s20 + $0x18] sm:$0xf] }
  0x4d   : > { %767 = vrot.lane.b32.xlu1 %v2315_v16, %s2794_s27  ;;  %v993_v16 = vsel %vm2924_vm5, %v988_v6, %v992_v7  ;;  %v1408_v58 = vshll.u32 %v2401_v55, 16  ;;  %v1412_v59 = vshrl.u32 %v2401_v55, 16  ;;  %v2413_v61 = vld [vmem:[%s2900_s20 + $0x4c] sm:$0xf]  ;;  %v1399_v63 = vshrl.u32 %v2400_v57, 16 }
  0x4e   : > { %v1187_v28 = vrot.slane %v1185_v19, 4  ;;  %v1186_v44 = vsel %vm2902_vm2, %v2380_v35, %v1185_v19  ;;  %v1402_v1 = vshll.u32 %v2400_v57, 16  ;;  %v2384_v62 = vld [vmem:[%s2900_s20 + $0x18] sm:$0xf]  ;;  %v1508_v6 = vshrl.u32 %v2413_v61, 16 }
  0x4f   : > { %765 = vrot.lane.b32.xlu0 %v2314_v24, %s2794_s27  ;;  %v248_v24 = vld [vmem:[%s2900_s20 + $0x34] sm:$0xf]  ;;  %v3103_v3 = vrot.slane %v1408_v58, 5  ;;  %v1414_v4 = vrot.slane %v1412_v59, 4  ;;  %v2393_v7 = vld [vmem:[%s2900_s20 + $0x4c] sm:$0xf] }
  0x50   : > { %265 = vst.msk [vmem:[#allocation2 + $0x24] sm:$0xf] %vm255_vm6, %v248_v24  ;;  %v1189_v39 = vsel %vm2902_vm2, %v1187_v28, %v1188_v29  ;;  %v2402_v8 = vld [vmem:[%s2900_s20 + $0x20] sm:$0x1]  ;;  %v1401_v9 = vrot.slane %v1399_v63, 4  ;;  %v1404_v10 = vrot.slane %v1402_v1, 5 }
  0x51   : > { %783 = vrot.lane.b32.xlu1 %v2323_v25, %s2794_s27  ;;  %v240_v25 = vld [vmem:[%s2900_s20 + $0x4] sm:$0xf]  ;;  %v2404_v13 = vld [vmem:[%s2900_s20 + $0x28] sm:$0xf]  ;;  %v1415_v15 = vor.u32 %v1414_v4, %v3103_v3  ;;  %v1510_v18 = vrot.slane %v1508_v6, 4 }
  0x52   : > { %257 = vst.msk [vmem:[#allocation2 + $0x4] sm:$0xf] %vm255_vm6, %v240_v25  ;;  %v2392_v14 = vld [vmem:[%s2900_s20 + $0x48] sm:$0xf]  ;;  %v2403_v19 = vld [vmem:[%s2900_s20 + $0x24] sm:$0xf]  ;;  %v1405_v24 = vor.u32 %v1404_v10, %v1401_v9 }
  0x53   : > { %781 = vrot.lane.b32.xlu0 %v2322_v41, %s2794_s27  ;;  %v1167_v41 = vrot.slane %v2357_v31, 5  ;;  %v2387_v20 = vld [vmem:[%s2900_s20 + $0x28] sm:$0xf]  ;;  %v2414_v21 = vld [vmem:[%s2900_s20 + $0x50] sm:$0x1]  ;;  %v1436_v23 = vshrl.u32 %v2404_v13, 16 }
  0x54   : > { %v2386_v28 = vld [vmem:[%s2900_s20 + $0x24] sm:$0xf]  ;;  %v2395_v29 = vld [vmem:[%s2900_s20 + $0x58] sm:$0xf]  ;;  %v1423_v30 = vshrl.u32 %v2403_v19, 16  ;;  %v1426_v31 = vshll.u32 %v2403_v19, 16 }
  0x55   : > { %1044 = vrot.lane.b32.xlu1 %v873_v46, %s2795_s28  ;;  %v250_v46 = vld [vmem:[%s2900_s20 + $0x40] sm:$0xf]  ;;  %v1168_v49 = vsel %vm2902_vm2, %v1166_v40, %v1167_v41  ;;  %v1416_v33 = vrot.slane %v1415_v15, 4  ;;  %v1514_v36 = vshll.u32 %v2414_v21, 16  ;;  %v2415_v37 = vld [vmem:[%s2900_s20 + $0x54] sm:$0xf] }
  0x56   : > { %267 = vst.msk [vmem:[#allocation2 + $0x2c] sm:$0xf] %vm255_vm6, %v250_v46  ;;  %v2405_v38 = vld [vmem:[%s2900_s20 + $0x2c] sm:$0x1]  ;;  %v1438_v40 = vrot.slane %v1436_v23, 4  ;;  %v1406_v43 = vrot.slane %v1405_v24, 4 }
  0x57   : > { %1042 = vrot.lane.b32.xlu0 %v863_v53, %s2795_s28  ;;  %v2381_v53 = vrot.slane %v2367_v47, 9  ;;  %v2394_v45 = vld [vmem:[%s2900_s20 + $0x54] sm:$0xf]  ;;  %v1425_v46 = vrot.slane %v1423_v30, 4  ;;  %v1428_v47 = vrot.slane %v1426_v31, 5  ;;  %v1519_v48 = vshrl.u32 %v2415_v37, 16 }
  0x58   : > { %v1516_v51 = vrot.slane %v1514_v36, 5  ;;  %v2417_v55 = vld [vmem:[%s2900_s20 + $0x5c] sm:$0x1]  ;;  %v1411_v58 = vsel %vm2924_vm5, %v1406_v43, %v3103_v3  ;;  %v291_v19 = vld [vmem:[%s2900_s20 + $0x4c] sm:$0xf] }
  0x59   : > { %1060 = vrot.lane.b32.xlu1 %v969_v60, %s2795_s28  ;;  %v1193_v56 = vsel %vm2902_vm2, %v2381_v53, %v1192_v42  ;;  %v2385_v60 = vld [vmem:[%s2900_s20 + $0x1c] sm:$0xf]  ;;  %v1538_v1 = vshll.u32 %v2417_v55, 16  ;;  %v290_v24 = vld [vmem:[%s2900_s20 + $0x48] sm:$0xf] }
  0x5a   : > { %v2425_v6 = vld [vmem:[%s2900_s20 + $0x1c] sm:$0xf]  ;;  %v2438_v31 = vld [vmem:[%s2900_s20 + $0x50] sm:$0x1]  ;;  %v280_v36 = vld [vmem:[%s2900_s20 + $0x20] sm:$0x1] }
  0x5b   : > { %1058 = vrot.lane.b32.xlu0 %v959_v2, %s2795_s28  ;;  %v2412_v2 = vld [vmem:[%s2900_s20 + $0x48] sm:$0xf]  ;;  %v279_v3 = vld [vmem:[%s2900_s20 + $0x1c] sm:$0xf]  ;;  %v1540_v10 = vrot.slane %v1538_v1, 5 }
  0x5c   : > { %v1498_v12 = vshll.u32 %v2412_v2, 16  ;;  %v3192_v1 = vld [vmem:[%s2900_s20 + $0x28] sm:$0xf] }
  0x5d   : > { %1048 = vrot.lane.b32.xlu1 %v897_v5, %s2795_s28  ;;  %v1504_v5 = vshll.u32 %v2413_v61, 16  ;;  %v1521_v61 = vrot.slane %v1519_v48, 4 }
  0x5e   : > { %v1500_v26 = vrot.slane %v1498_v12, 5  ;;  %v1705_v12 = vrot.slane %v2425_v6, 5 }
  0x5f   : > { %1046 = vrot.lane.b32.xlu0 %v887_v11, %s2795_s28  ;;  %v1495_v11 = vshrl.u32 %v2412_v2, 16  ;;  %v3112_v17 = vrot.slane %v1504_v5, 5 }
  0x61   : > { %1064 = vrot.lane.b32.xlu1 %v993_v16, %s2795_s28  ;;  %v1418_v16 = vshll.u32 %v2402_v8, 16  ;;  %v1497_v25 = vrot.slane %v1495_v11, 4  ;;  %v1511_v35 = vor.u32 %v1510_v18, %v3112_v17  ;;  %v2426_v11 = vld [vmem:[%s2900_s20 + $0x20] sm:$0x1]  ;;  %v361_v18 = vshrl.u32 %v279_v3, 16 }
  0x63   : > { %1062 = vrot.lane.b32.xlu0 %v983_v22, %s2795_s28  ;;  %v1432_v22 = vshll.u32 %v2404_v13, 16  ;;  %v1512_v53 = vrot.slane %v1511_v35, 4  ;;  %v278_v13 = vld [vmem:[%s2900_s20 + $0x18] sm:$0xf]  ;;  %v363_v35 = vrot.slane %v361_v18, 4 }
  0x64   : > { %v351_v23 = vshll.u32 %v278_v13, 16 }
  0x65   : > { %1213 = vrot.lane.b32.xlu1 %v1161_v27, %s2796_s29  ;;  %v2416_v27 = vld [vmem:[%s2900_s20 + $0x58] sm:$0xf] }
  0x66   : > { %v1528_v41 = vshll.u32 %v2416_v27, 16  ;;  %v1532_v42 = vshrl.u32 %v2416_v27, 16  ;;  %v2424_v27 = vld [vmem:[%s2900_s20 + $0x18] sm:$0xe]  ;;  %v353_v43 = vrot.slane %v351_v23, 5 }
  0x67   : > { %1211 = vrot.lane.b32.xlu0 %v1158_v34, %s2796_s29  ;;  %v1420_v34 = vrot.slane %v1418_v16, 5  ;;  %v357_v16 = vshll.u32 %v279_v3, 16 }
  0x68   : > { %v1534_v57 = vrot.slane %v1532_v42, 4 }
  0x69   : > { %1229 = vrot.lane.b32.xlu1 %v1189_v39, %s2796_s29  ;;  %v3125_v39 = vrot.slane %v1432_v22, 5  ;;  %v1421_v50 = vsel %vm2924_vm5, %v1416_v33, %v1420_v34  ;;  %v348_v22 = vshrl.u32 %v278_v13, 16  ;;  %v3167_v34 = vrot.slane %v357_v16, 5  ;;  %v3206_v13 = vld [vmem:[%s2900_s20 + $0x58] sm:$0xf] }
  0x6b   : > { %1227 = vrot.lane.b32.xlu0 %v1186_v44, %s2796_s29  ;;  %v1501_v44 = vor.u32 %v1500_v26, %v1497_v25  ;;  %v1707_v25 = vrot.slane %v1705_v12, 4  ;;  %v1708_v26 = vrot.slane %v2426_v11, 5  ;;  %v350_v42 = vrot.slane %v348_v22, 4 }
  0x6d   : > { %1217 = vrot.lane.b32.xlu1 %v1168_v49, %s2796_s29  ;;  %v1522_v49 = vshll.u32 %v2415_v37, 16  ;;  %v1502_v59 = vrot.slane %v1501_v44, 4  ;;  %v444_v37 = vshrl.u32 %v290_v24, 16  ;;  %v1736_v44 = vrot.slane %v2438_v31, 5 }
  0x6e   : > { %v1709_v48 = vsel %vm2902_vm2, %v1707_v25, %v1708_v26 }
  0x6f   : > { %1215 = vrot.lane.b32.xlu0 %v1165_v52, %s2796_s29  ;;  %v1442_v52 = vshll.u32 %v2405_v38, 16  ;;  %v1524_v63 = vrot.slane %v1522_v49, 5  ;;  %v447_v38 = vshll.u32 %v290_v24, 16  ;;  %v243_v24 = vld [vmem:[%s2900_s20 + $0x18] sm:$0xf] }
  0x70   : > { %260 = vst.msk [vmem:[#allocation2 + $0x10] sm:$0xf] %vm255_vm6, %v243_v24  ;;  %v575_v24 = vld [vmem:[%s2900_s20 + $0x4c] sm:$0xf] }
  0x71   : > { %1233 = vrot.lane.b32.xlu1 %v1196_v54, %s2796_s29  ;;  %v1439_v54 = vor.u32 %v1438_v40, %v3125_v39  ;;  %v1444_v4 = vrot.slane %v1442_v52, 5  ;;  %v1525_v9 = vor.u32 %v1524_v63, %v1521_v61  ;;  %v2448_v40 = vrot.slane %v2424_v27, 9 }
  0x72   : > { %v446_v52 = vrot.slane %v444_v37, 4 }
  0x73   : > { %1231 = vrot.lane.b32.xlu0 %v1193_v56, %s2796_s29  ;;  %v3134_v56 = vrot.slane %v1528_v41, 5  ;;  %v1440_v2 = vrot.slane %v1439_v54, 4  ;;  %v1526_v21 = vrot.slane %v1525_v9, 4  ;;  %v2436_v41 = vld [vmem:[%s2900_s20 + $0x48] sm:$0xe]  ;;  %v1706_v54 = vsel %vm2902_vm2, %v2448_v40, %v1705_v12 }
  0x74   : > { %v2452_v55 = vrot.slane %v2436_v41, 9  ;;  %v1712_v9 = vrot.slane %v3192_v1, 5  ;;  %v2427_v12 = vld [vmem:[%s2900_s20 + $0x24] sm:$0xe]  ;;  %v283_v40 = vld [vmem:[%s2900_s20 + $0x2c] sm:$0x1] }
  0x75   : > { %1311 = vrot.lane.b32.xlu1 %v2385_v60, %s2797_s4  ;;  %v1429_v60 = vor.u32 %v1428_v47, %v1425_v46  ;;  %v1535_v5 = vor.u32 %v1534_v57, %v3134_v56  ;;  %v251_v41 = vld [vmem:[%s2900_s20 + $0x48] sm:$0xf] }
  0x76   : > { %v1714_v27 = vrot.slane %v1712_v9, 4  ;;  %268 = vst.msk [vmem:[#allocation2 + $0x30] sm:$0xf] %vm255_vm6, %v251_v41  ;;  %v574_v41 = vld [vmem:[%s2900_s20 + $0x48] sm:$0xe] }
  0x77   : > { %1309 = vrot.lane.b32.xlu0 %v2384_v62, %s2797_s4  ;;  %v1517_v62 = vsel %vm2924_vm5, %v1512_v53, %v1516_v51  ;;  %v1430_v8 = vrot.slane %v1429_v60, 4  ;;  %v1536_v15 = vrot.slane %v1535_v5, 4  ;;  %v367_v51 = vshll.u32 %v280_v36, 16  ;;  %v252_v36 = vld [vmem:[%s2900_s20 + $0x4c] sm:$0xf] }
  0x78   : > { %v449_v53 = vrot.slane %v447_v38, 5  ;;  %269 = vst.msk [vmem:[#allocation2 + $0x34] sm:$0xf] %vm255_vm6, %v252_v36  ;;  %v576_v36 = vld [vmem:[%s2900_s20 + $0x50] sm:$0x1] }
  0x79   : > { %1327 = vrot.lane.b32.xlu1 %v2393_v7, %s2797_s4  ;;  %v1507_v7 = vsel %vm2924_vm5, %v1502_v59, %v3112_v17  ;;  %v2437_v17 = vld [vmem:[%s2900_s20 + $0x4c] sm:$0xf]  ;;  %v1541_v30 = vsel %vm2924_vm5, %v1536_v15, %v1540_v10  ;;  %v369_v63 = vrot.slane %v367_v51, 5  ;;  %v281_v10 = vld [vmem:[%s2900_s20 + $0x24] sm:$0xf] }
  0x7a   : > { %v1733_v33 = vrot.slane %v2437_v17, 5  ;;  %v244_v17 = vld [vmem:[%s2900_s20 + $0x1c] sm:$0xf]  ;;  %v372_v22 = vshrl.u32 %v281_v10, 16  ;;  %v375_v23 = vshll.u32 %v281_v10, 16  ;;  %v2627_v10 = vld [vmem:[%s3784_s1] sm:$0xff]  }
  0x7b   : > { %1325 = vrot.lane.b32.xlu0 %v2392_v14, %s2797_s4  ;;  %v1445_v14 = vsel %vm2924_vm5, %v1440_v2, %v1444_v4  ;;  %v450_v2 = vor.u32 %v449_v53, %v446_v52  ;;  %v282_v4 = vld [vmem:[%s2900_s20 + $0x28] sm:$0xf]  ;;  %261 = vst.msk [vmem:[#allocation2 + $0x14] sm:$0xf] %vm255_vm6, %v244_v17  ;;  %v391_v52 = vshll.u32 %v283_v40, 16 }
  0x7c   : > { %v1735_v49 = vrot.slane %v1733_v33, 4  ;;  %v1734_v5 = vsel %vm2902_vm2, %v2452_v55, %v1733_v33  ;;  %v385_v15 = vshrl.u32 %v282_v4, 16  ;;  %v2624_v55 = vld [vmem:[%s3784_s1 + $0x10] ss:$0 sps:$4 sm:$0x33]  }
  0x7d   : > { %1315 = vrot.lane.b32.xlu1 %v2387_v20, %s2797_s4  ;;  %v1435_v20 = vsel %vm2924_vm5, %v1430_v8, %v3125_v39  ;;  %v1531_v39 = vsel %vm2924_vm5, %v1526_v21, %v3134_v56  ;;  %v354_v56 = vor.u32 %v353_v43, %v350_v42  ;;  %v2429_v8 = vld [vmem:[%s2900_s20 + $0x2c] sm:$0x1]  ;;  %v451_v18 = vrot.slane %v450_v2, 4  ;;  %v2439_v42 = vld [vmem:[%s2900_s20 + $0x54] sm:$0xe]  ;;  %2539 = vmatprep.subr.msk.bf16.mxu0 %vm1932_vm9, %v2624_v55 }
  0x7e   : > { %v1737_v60 = vsel %vm2902_vm2, %v1735_v49, %v1736_v44  ;;  %v1715_v21 = vrot.slane %v2429_v8, 5  ;;  %v387_v33 = vrot.slane %v385_v15, 4  ;;  %v374_v43 = vrot.slane %v372_v22, 4  ;;  %2540 = vmatprep.subr.msk.bf16.mxu1 %vm1932_vm9, %v2624_v55  ;;  %v246_v15 = vld [vmem:[%s2900_s20 + $0x28] sm:$0xf] }
  0x7f   : > { %1313 = vrot.lane.b32.xlu0 %v2386_v28, %s2797_s4  ;;  %v453_v28 = vshll.u32 %v291_v19, 16  ;;  %v355_v6 = vrot.slane %v354_v56, 4  ;;  %v377_v44 = vrot.slane %v375_v23, 5  ;;  %263 = vst.msk [vmem:[#allocation2 + $0x1c] sm:$0xf] %vm255_vm6, %v246_v15 }
  0x80   : > { %v564_v23 = vld [vmem:[%s2900_s20 + $0x20] sm:$0x1] }
  0x81   : > { %1331 = vrot.lane.b32.xlu1 %v2395_v29, %s2797_s4  ;;  %v457_v29 = vshrl.u32 %v291_v19, 16  ;;  %v3177_v46 = vrot.slane %v453_v28, 5  ;;  %v294_v19 = vld [vmem:[%s2900_s20 + $0x58] sm:$0xf]  ;;  %v2441_v28 = vld [vmem:[%s2900_s20 + $0x5c] sm:$0x1] }
  0x83   : > { %1329 = vrot.lane.b32.xlu0 %v2394_v45, %s2797_s4  ;;  %v292_v45 = vld [vmem:[%s2900_s20 + $0x50] sm:$0x1]  ;;  %v459_v47 = vrot.slane %v457_v29, 4  ;;  %v1740_v29 = vrot.slane %v3206_v13, 5  ;;  %v456_v38 = vsel %vm2924_vm5, %v451_v18, %v3177_v46 }
  0x84   : > { %v463_v57 = vshll.u32 %v292_v45, 16 }
  0x85   : > { %1592 = vrot.lane.b32.xlu1 %v1421_v50, %s2798_s5  ;;  %v364_v50 = vor.u32 %v363_v35, %v3167_v34  ;;  %v481_v35 = vshrl.u32 %v294_v19, 16  ;;  %v1742_v49 = vrot.slane %v1740_v29, 4 }
  0x86   : > { %v465_v3 = vrot.slane %v463_v57, 5 }
  0x87   : > { %1590 = vrot.lane.b32.xlu0 %v1411_v58, %s2798_s5  ;;  %v460_v58 = vor.u32 %v459_v47, %v3177_v46  ;;  %v365_v61 = vrot.slane %v364_v50, 4  ;;  %v1716_v46 = vsel %vm2902_vm2, %v1714_v27, %v1715_v21  ;;  %v1743_v50 = vrot.slane %v2441_v28, 5  ;;  %v254_v21 = vld [vmem:[%s2900_s20 + $0x58] sm:$0xf] }
  0x88   : > { %271 = vst.msk [vmem:[#allocation2 + $0x3c] sm:$0xf] %vm255_vm6, %v254_v21  ;;  %v2346_v21 = vld [vmem:[%s2900_s20 + $0x54] sm:$0xf] }
  0x89   : > { %1608 = vrot.lane.b32.xlu1 %v1517_v62, %s2798_s5  ;;  %v370_v11 = vsel %vm2924_vm5, %v365_v61, %v369_v63  ;;  %v2626_v61 = vld [vmem:[%s3784_s1 + $0x8] sm:$0xff]   ;;  %v378_v63 = vor.u32 %v377_v44, %v374_v43  ;;  %v654_v44 = vrot.slane %v576_v36, 5  ;;  %v2324_v36 = vld [vmem:[%s2900_s20 + $0x54] sm:$0xf] }
  0x8b   : > { %1606 = vrot.lane.b32.xlu0 %v1507_v7, %s2798_s5  ;;  %v461_v7 = vrot.slane %v460_v58, 4  ;;  %v2453_v58 = vrot.slane %v2439_v42, 9 }
  0x8d   : > { %1596 = vrot.lane.b32.xlu1 %v1445_v14, %s2798_s5  ;;  %v381_v14 = vshll.u32 %v282_v4, 16  ;;  %v466_v26 = vsel %vm2924_vm5, %v461_v7, %v465_v3  ;;  %v1744_v4 = vsel %vm2902_vm2, %v1742_v49, %v1743_v50  ;;  %v2310_v50 = vrot.slane %v574_v41, 9 }
  0x8f   : > { %1594 = vrot.lane.b32.xlu0 %v1435_v20, %s2798_s5  ;;  %v360_v20 = vsel %vm2924_vm5, %v355_v6, %v3167_v34  ;;  %v3227_v31 = vrot.slane %v381_v14, 5  ;;  %v477_v34 = vshll.u32 %v294_v19, 16  ;;  %v393_v6 = vrot.slane %v391_v52, 5  ;;  %v565_v52 = vld [vmem:[%s2900_s20 + $0x24] sm:$0xe] }
  0x91   : > { %1612 = vrot.lane.b32.xlu1 %v1541_v30, %s2798_s5  ;;  %v293_v30 = vld [vmem:[%s2900_s20 + $0x54] sm:$0xf]  ;;  %v388_v51 = vor.u32 %v387_v33, %v3227_v31  ;;  %v3248_v53 = vrot.slane %v477_v34, 5  ;;  %v626_v34 = vrot.slane %v564_v23, 5 }
  0x92   : > { %v468_v45 = vshrl.u32 %v293_v30, 16  ;;  %v471_v47 = vshll.u32 %v293_v30, 16 }
  0x93   : > { %1610 = vrot.lane.b32.xlu0 %v1531_v39, %s2798_s5  ;;  %v2449_v39 = vrot.slane %v2427_v12, 9  ;;  %v379_v12 = vrot.slane %v378_v63, 4 }
  0x94   : > { %v664_v62 = vpop.permute.xlu0 %663  ;;  %v473_v2 = vrot.slane %v471_v47, 5 }
  0x95   : > { %1761 = vrot.lane.b32.xlu1 %v1709_v48, %s2799_s6  ;;  %v1713_v57 = vsel %vm2902_vm2, %v2449_v39, %v1712_v9  ;;  %v3272_v9 = vld [vmem:[%s2900_s20 + $0x1c] sm:$0xf] }
  0x96   : > { %v3187_v59 = vpop.permute.xlu1 %665 }
  0x97   : > { %1759 = vrot.lane.b32.xlu0 %v1706_v54, %s2799_s6  ;;  %v483_v54 = vrot.slane %v481_v35, 4 }
  0x99   : > { %1777 = vrot.lane.b32.xlu1 %v1737_v60, %s2799_s6  ;;  %v295_v60 = vld [vmem:[%s2900_s20 + $0x5c] sm:$0x1]  ;;  %v484_v3 = vor.u32 %v483_v54, %v3248_v53 }
  0x9a   : > { %v487_v7 = vshll.u32 %v295_v60, 16 }
  0x9b   : > { %1775 = vrot.lane.b32.xlu0 %v1734_v5, %s2799_s6  ;;  %v508_v16 = vpop.permute.xlu1 %507  ;;  %v389_v5 = vrot.slane %v388_v51, 4  ;;  %v485_v19 = vrot.slane %v484_v3, 4 }
  0x9c   : > { %548 = vst.msk [vmem:[#allocation2 + $0x20] sm:$0xf] %vm539_vm7, %v508_v16  ;;  %v245_v16 = vld [vmem:[%s2900_s20 + $0x24] sm:$0xf]  ;;  %v489_v17 = vrot.slane %v487_v7, 5 }
  0x9d   : > { %v492_v25 = vpop.permute.xlu0 %491  ;;  %501 = vrot.lane.b32.xlu1 %v370_v11, %s2793_s24  ;;  %v1741_v11 = vsel %vm2902_vm2, %v2453_v58, %v1740_v29  ;;  %262 = vst.msk [vmem:[#allocation2 + $0x18] sm:$0xf] %vm255_vm6, %v245_v16  ;;  %v394_v13 = vsel %vm2924_vm5, %v389_v5, %v393_v6  ;;  %v562_v29 = vld [vmem:[%s2900_s20 + $0x18] sm:$0xe]  ;;  %v579_v58 = vld [vmem:[%s2900_s20 + $0x5c] sm:$0x1] }
  0x9e   : > { %540 = vst.msk [vmem:[#allocation2] sm:$0xf] %vm539_vm7, %v492_v25  ;;  %v253_v25 = vld [vmem:[%s2900_s20 + $0x54] sm:$0xf]  ;;  %v490_v30 = vsel %vm2924_vm5, %v485_v19, %v489_v17  ;;  %v2306_v39 = vrot.slane %v562_v29, 9 }
  0x9f   : > { %499 = vrot.lane.b32.xlu0 %v360_v20, %s2793_s24  ;;  %v510_v37 = vpop.permute.xlu1 %509  ;;  %712 = vst.msk [vmem:[#allocation2] sm:$0xf] %vm711_vm8, %v664_v62  ;;  %v470_v62 = vrot.slane %v468_v45, 4  ;;  %v623_v20 = vrot.slane %v3272_v9, 5  ;;  %v2317_v16 = vld [vmem:[%s2900_s20 + $0x28] sm:$0xf] }
  0xa0   : > { %549 = vst.msk [vmem:[#allocation2 + $0x24] sm:$0xf] %vm539_vm7, %v510_v37  ;;  %v566_v37 = vld [vmem:[%s2900_s20 + $0x28] sm:$0xf] }
  0xa1   : > { %v494_v48 = vpop.permute.xlu0 %493  ;;  %517 = vrot.lane.b32.xlu1 %v466_v26, %s2793_s24  ;;  %v474_v14 = vor.u32 %v473_v2, %v470_v62  ;;  %v384_v26 = vsel %vm2924_vm5, %v379_v12, %v3227_v31  ;;  %270 = vst.msk [vmem:[#allocation2 + $0x38] sm:$0xf] %vm255_vm6, %v253_v25  ;;  %v625_v33 = vrot.slane %v623_v20, 4  ;;  %v651_v31 = vrot.slane %v575_v24, 5  ;;  %v577_v62 = vld [vmem:[%s2900_s20 + $0x54] sm:$0xe] }
  0xa2   : > { %541 = vst.msk [vmem:[#allocation2 + $0x4] sm:$0xf] %vm539_vm7, %v494_v48  ;;  %v630_v45 = vrot.slane %v566_v37, 5  ;;  %v567_v48 = vld [vmem:[%s2900_s20 + $0x2c] sm:$0x1]  ;;  %v624_v49 = vsel %vm2902_vm2, %v2306_v39, %v623_v20  ;;  %v2311_v6 = vrot.slane %v577_v62, 9 }
  0xa3   : > { %515 = vrot.lane.b32.xlu0 %v456_v38, %s2793_s24  ;;  %v498_v56 = vpop.permute.xlu1 %497  ;;  %713 = vst.msk [vmem:[#allocation2 + $0x4] sm:$0xf] %vm711_vm8, %v3187_v59  ;;  %v1934_v59 = vsel %vm1932_vm9, %v2624_v55, 0  ;;  %v475_v27 = vrot.slane %v474_v14, 4  ;;  %v627_v42 = vsel %vm2902_vm2, %v625_v33, %v626_v34  ;;  %v653_v43 = vrot.slane %v651_v31, 4 }
  0xa4   : > { %543 = vst.msk [vmem:[#allocation2 + $0xc] sm:$0xf] %vm539_vm7, %v498_v56  ;;  %2512 = vmatpush3.bf16.msra.mxu0 %v1934_v59  ;;  %2536 = vmatpush3.bf16.msra.mxu1 %v1934_v59  ;;  %v632_v54 = vrot.slane %v630_v45, 4  ;;  %v633_v55 = vrot.slane %v567_v48, 5  ;;  %v652_v60 = vsel %vm2902_vm2, %v2310_v50, %v651_v31  ;;  %v2316_v20 = vld [vmem:[%s2900_s20 + $0x24] sm:$0xf] }
  0xa5   : > { %v496_v1 = vpop.permute.xlu0 %495  ;;  %1765 = vrot.lane.b32.xlu1 %v1716_v46, %s2799_s6  ;;  %2513 = vmatprep.subr.bf16.mxu0 %v2626_v61  ;;  %v480_v38 = vsel %vm2924_vm5, %v475_v27, %v3248_v53  ;;  %v578_v46 = vld [vmem:[%s2900_s20 + $0x58] sm:$0xf]  ;;  %v655_v53 = vsel %vm2902_vm2, %v653_v43, %v654_v44  ;;  %v995_v34 = vshrl.u32 %v2346_v21, 16  ;;  %v998_v31 = vshll.u32 %v2346_v21, 16  ;;  %v2319_v43 = vld [vmem:[%s2900_s20 + $0x34] sm:$0xf] }
  0xa6   : > { %542 = vst.msk [vmem:[#allocation2 + $0x8] sm:$0xf] %vm539_vm7, %v496_v1  ;;  %2534 = vmatprep.subr.bf16.mxu1 %v2626_v61  ;;  %v658_v56 = vrot.slane %v578_v46, 5  ;;  %v634_v2 = vsel %vm2902_vm2, %v632_v54, %v633_v55  ;;  %v2325_v27 = vld [vmem:[%s2900_s20 + $0x58] sm:$0xf] }
  0xa7   : > { %1763 = vrot.lane.b32.xlu0 %v1713_v57, %s2799_s6  ;;  %v514_v8 = vpop.permute.xlu1 %513  ;;  %v2348_v44 = vld [vmem:[%s2900_s20 + $0x5c] sm:$0x1]  ;;  %v1000_v50 = vrot.slane %v998_v31, 5  ;;  %v2339_v62 = vld [vmem:[%s2900_s20 + $0x38] sm:$0x1] }
  0xa8   : > { %551 = vst.msk [vmem:[#allocation2 + $0x2c] sm:$0xf] %vm539_vm7, %v514_v8  ;;  %2514 = vmatpush3.bf16.msra.mxu0 %v2626_v61  ;;  %2537 = vmatpush3.bf16.msra.mxu1 %v2626_v61  ;;  %v2307_v61 = vrot.slane %v565_v52, 9  ;;  %v660_v1 = vrot.slane %v658_v56, 4  ;;  %v2335_v8 = vld [vmem:[%s2900_s20 + $0x28] sm:$0xf] }
  0xa9   : > { %v512_v18 = vpop.permute.xlu0 %511  ;;  %1781 = vrot.lane.b32.xlu1 %v1744_v4, %s2799_s6  ;;  %2515 = vmatprep.subr.bf16.mxu0 %v2627_v10  ;;  %v661_v4 = vrot.slane %v579_v58, 5  ;;  %v908_v14 = vshll.u32 %v2335_v8, 16  ;;  %v912_v15 = vshrl.u32 %v2335_v8, 16  ;;  %v2318_v52 = vld [vmem:[%s2900_s20 + $0x30] sm:$0xf] }
  0xaa   : > { %550 = vst.msk [vmem:[#allocation2 + $0x28] sm:$0xf] %vm539_vm7, %v512_v18  ;;  %2535 = vmatprep.subr.bf16.mxu1 %v2627_v10  ;;  %v631_v5 = vsel %vm2902_vm2, %v2307_v61, %v630_v45  ;;  %v2347_v18 = vld [vmem:[%s2900_s20 + $0x58] sm:$0xf]  ;;  %v1014_v61 = vshll.u32 %v2348_v44, 16 }
  0xab   : > { %1779 = vrot.lane.b32.xlu0 %v1741_v11, %s2799_s6  ;;  %v682_v22 = vpop.permute.xlu1 %681  ;;  %v662_v7 = vsel %vm2902_vm2, %v660_v1, %v661_v4  ;;  %v2334_v11 = vld [vmem:[%s2900_s20 + $0x24] sm:$0xf]  ;;  %v3363_v23 = vrot.slane %v908_v14, 5  ;;  %v914_v24 = vrot.slane %v912_v15, 4  ;;  %v1004_v25 = vshll.u32 %v2347_v18, 16 }
  0xac   : > { %721 = vst.msk [vmem:[#allocation2 + $0x24] sm:$0xf] %vm711_vm8, %v682_v22  ;;  %2516 = vmatpush3.bf16.msra.mxu0 %v2627_v10  ;;  %2538 = vmatpush3.bf16.msra.mxu1 %v2627_v10  ;;  %v659_v10 = vsel %vm2902_vm2, %v2311_v6, %v658_v56  ;;  %v899_v19 = vshrl.u32 %v2334_v11, 16  ;;  %v902_v17 = vshll.u32 %v2334_v11, 16  ;;  %v1016_v15 = vrot.slane %v1014_v61, 5 }
  0xad   : > { %v680_v28 = vpop.permute.xlu0 %679  ;;  %505 = vrot.lane.b32.xlu1 %v394_v13, %s2793_s24 }
  0xae   : > { %720 = vst.msk [vmem:[#allocation2 + $0x20] sm:$0xf] %vm711_vm8, %v680_v28  ;;  %v2336_v28 = vld [vmem:[%s2900_s20 + $0x2c] sm:$0x1]  ;;  %v904_v33 = vrot.slane %v902_v17, 5 }
  0xaf   : > { %503 = vrot.lane.b32.xlu0 %v384_v26, %s2793_s24  ;;  %v670_v35 = vpop.permute.xlu1 %669  ;;  %v1008_v26 = vshrl.u32 %v2347_v18, 16  ;;  %v918_v39 = vshll.u32 %v2336_v28, 16 }
  0xb0   : > { %715 = vst.msk [vmem:[#allocation2 + $0xc] sm:$0xf] %vm711_vm8, %v670_v35  ;;  %v2338_v35 = vld [vmem:[%s2900_s20 + $0x34] sm:$0xf] }
  0xb1   : > { %v668_v40 = vpop.permute.xlu0 %667  ;;  %521 = vrot.lane.b32.xlu1 %v490_v30, %s2793_s24  ;;  %v901_v30 = vrot.slane %v899_v19, 4  ;;  %v1010_v41 = vrot.slane %v1008_v26, 4  ;;  %v932_v45 = vshll.u32 %v2338_v35, 16  ;;  %v920_v58 = vrot.slane %v918_v39, 5 }
  0xb2   : > { %714 = vst.msk [vmem:[#allocation2 + $0x8] sm:$0xf] %vm711_vm8, %v668_v40  ;;  %v3374_v40 = vrot.slane %v1004_v25, 5 }
  0xb3   : > { %519 = vrot.lane.b32.xlu0 %v480_v38, %s2793_s24  ;;  %v686_v47 = vpop.permute.xlu1 %685  ;;  %v915_v38 = vor.u32 %v914_v24, %v3363_v23  ;;  %v905_v46 = vor.u32 %v904_v33, %v901_v30 }
  0xb4   : > { %723 = vst.msk [vmem:[#allocation2 + $0x2c] sm:$0xf] %vm711_vm8, %v686_v47  ;;  %v936_v47 = vshrl.u32 %v2338_v35, 16  ;;  %v2359_v35 = vld [vmem:[%s2900_s20 + $0x28] sm:$0xf] }
  0xb5   : > { %v684_v51 = vpop.permute.xlu0 %683  ;;  %673 = vrot.lane.b32.xlu1 %v627_v42, %s2792_s21  ;;  %v2337_v42 = vld [vmem:[%s2900_s20 + $0x30] sm:$0xf]  ;;  %v906_v6 = vrot.slane %v905_v46, 4  ;;  %v1171_v44 = vrot.slane %v2359_v35, 5 }
  0xb6   : > { %722 = vst.msk [vmem:[#allocation2 + $0x28] sm:$0xf] %vm711_vm8, %v684_v51  ;;  %v2350_v51 = vld [vmem:[%s2900_s20 + $0x64] sm:$0xf]  ;;  %v923_v54 = vshrl.u32 %v2337_v42, 16  ;;  %v926_v55 = vshll.u32 %v2337_v42, 16 }
  0xb7   : > { %671 = vrot.lane.b32.xlu0 %v624_v49, %s2792_s21  ;;  %v764_v57 = vpop.permute.xlu1 %763  ;;  %v997_v49 = vrot.slane %v995_v34, 4  ;;  %v938_v1 = vrot.slane %v936_v47, 4  ;;  %v1028_v4 = vshll.u32 %v2350_v51, 16  ;;  %v911_v21 = vsel %vm2924_vm5, %v906_v6, %v3363_v23  ;;  %v2360_v47 = vld [vmem:[%s2900_s20 + $0x2c] sm:$0x1] }
  0xb8   : > { %811 = vst.msk [vmem:[#allocation2 + $0x4] sm:$0xf] %vm809_vm10, %v764_v57  ;;  %v916_v57 = vrot.slane %v915_v38, 4  ;;  %v925_v8 = vrot.slane %v923_v54, 4  ;;  %v2374_v6 = vld [vmem:[%s2900_s20 + $0x64] sm:$0xf] }
  0xb9   : > { %v762_v63 = vpop.permute.xlu0 %761  ;;  %689 = vrot.lane.b32.xlu1 %v655_v53, %s2792_s21  ;;  %v2327_v53 = vld [vmem:[%s2900_s20 + $0x64] sm:$0xf]  ;;  %v3400_v19 = vrot.slane %v1028_v4, 5 }
  0xba   : > { %810 = vst.msk [vmem:[#allocation2] sm:$0xf] %vm809_vm10, %v762_v63  ;;  %v2349_v63 = vld [vmem:[%s2900_s20 + $0x60] sm:$0xf]  ;;  %v921_v14 = vsel %vm2924_vm5, %v916_v57, %v920_v58  ;;  %v2362_v57 = vld [vmem:[%s2900_s20 + $0x34] sm:$0xf] }
  0xbb   : > { %687 = vrot.lane.b32.xlu0 %v652_v60, %s2792_s21  ;;  %v780_v59 = vpop.permute.xlu1 %779  ;;  %v1011_v60 = vor.u32 %v1010_v41, %v3374_v40  ;;  %v1022_v11 = vshll.u32 %v2349_v63, 16  ;;  %v1178_v4 = vrot.slane %v2362_v57, 5 }
  0xbc   : > { %819 = vst.msk [vmem:[#allocation2 + $0x24] sm:$0xf] %vm809_vm10, %v780_v59  ;;  %v1032_v59 = vshrl.u32 %v2350_v51, 16 }
  0xbd   : > { %v778_v3 = vpop.permute.xlu0 %777  ;;  %677 = vrot.lane.b32.xlu1 %v634_v2, %s2792_s21  ;;  %v3390_v2 = vrot.slane %v932_v45, 5  ;;  %v1012_v18 = vrot.slane %v1011_v60, 4 }
  0xbe   : > { %818 = vst.msk [vmem:[#allocation2 + $0x20] sm:$0xf] %vm809_vm10, %v778_v3  ;;  %v1001_v3 = vor.u32 %v1000_v50, %v997_v49  ;;  %v1034_v17 = vrot.slane %v1032_v59, 4  ;;  %v2358_v50 = vld [vmem:[%s2900_s20 + $0x24] sm:$0xe] }
  0xbf   : > { %675 = vrot.lane.b32.xlu0 %v631_v5, %s2792_s21  ;;  %v768_v9 = vpop.permute.xlu1 %767  ;;  %v1017_v30 = vsel %vm2924_vm5, %v1012_v18, %v1016_v15  ;;  %v2378_v60 = vrot.slane %v2358_v50, 9 }
  0xc0   : > { %813 = vst.msk [vmem:[#allocation2 + $0xc] sm:$0xf] %vm809_vm10, %v768_v9  ;;  %v928_v9 = vrot.slane %v926_v55, 5  ;;  %v1002_v24 = vrot.slane %v1001_v3, 4  ;;  %v1035_v23 = vor.u32 %v1034_v17, %v3400_v19  ;;  %v2373_v17 = vld [vmem:[%s2900_s20 + $0x60] sm:$0xe] }
  0xc1   : > { %v766_v12 = vpop.permute.xlu0 %765  ;;  %693 = vrot.lane.b32.xlu1 %v662_v7, %s2792_s21  ;;  %v2326_v7 = vld [vmem:[%s2900_s20 + $0x60] sm:$0xf]  ;;  %v1172_v3 = vsel %vm2902_vm2, %v2378_v60, %v1171_v44 }
  0xc2   : > { %812 = vst.msk [vmem:[#allocation2 + $0x8] sm:$0xf] %vm809_vm10, %v766_v12  ;;  %v929_v25 = vor.u32 %v928_v9, %v925_v8  ;;  %v1036_v42 = vrot.slane %v1035_v23, 4  ;;  %v2361_v9 = vld [vmem:[%s2900_s20 + $0x30] sm:$0xe] }
  0xc3   : > { %691 = vrot.lane.b32.xlu0 %v659_v10, %s2792_s21  ;;  %v784_v13 = vpop.permute.xlu1 %783  ;;  %v1019_v10 = vshrl.u32 %v2349_v63, 16  ;;  %v2370_v63 = vld [vmem:[%s2900_s20 + $0x54] sm:$0xe]  ;;  %v2406_v23 = vld [vmem:[%s2900_s20 + $0x30] sm:$0xf] }
  0xc4   : > { %821 = vst.msk [vmem:[#allocation2 + $0x2c] sm:$0xf] %vm809_vm10, %v784_v13  ;;  %v939_v13 = vor.u32 %v938_v1, %v3390_v2 }
  0xc5   : > { %v782_v22 = vpop.permute.xlu0 %781  ;;  %771 = vrot.lane.b32.xlu1 %v2317_v16, %s2794_s27  ;;  %v942_v16 = vshll.u32 %v2339_v62, 16  ;;  %v1021_v26 = vrot.slane %v1019_v10, 4 }
  0xc6   : > { %820 = vst.msk [vmem:[#allocation2 + $0x28] sm:$0xf] %vm809_vm10, %v782_v22  ;;  %v2351_v22 = vld [vmem:[%s2900_s20 + $0x68] sm:$0x1]  ;;  %v940_v33 = vrot.slane %v939_v13, 4  ;;  %v2379_v13 = vrot.slane %v2361_v9, 9 }
  0xc7   : > { %769 = vrot.lane.b32.xlu0 %v2316_v20, %s2794_s27  ;;  %v1045_v29 = vpop.permute.xlu1 %1044  ;;  %v1038_v34 = vshll.u32 %v2351_v22, 16  ;;  %v2390_v9 = vld [vmem:[%s2900_s20 + $0x3c] sm:$0xf] }
  0xc8   : > { %1092 = vst.msk [vmem:[#allocation2 + $0x4] sm:$0xf] %vm1090_vm11, %v1045_v29  ;;  %v944_v29 = vrot.slane %v942_v16, 5  ;;  %v2375_v16 = vld [vmem:[%s2900_s20 + $0x68] sm:$0x1] }
  0xc9   : > { %v1043_v37 = vpop.permute.xlu0 %1042  ;;  %787 = vrot.lane.b32.xlu1 %v2325_v27, %s2794_s27  ;;  %v1024_v27 = vrot.slane %v1022_v11, 5  ;;  %v1180_v11 = vrot.slane %v1178_v4, 4  ;;  %v1209_v22 = vrot.slane %v2375_v16, 5 }
  0xca   : > { %1091 = vst.msk [vmem:[#allocation2] sm:$0xf] %vm1090_vm11, %v1043_v37  ;;  %v930_v37 = vrot.slane %v929_v25, 4  ;;  %v945_v41 = vsel %vm2924_vm5, %v940_v33, %v944_v29  ;;  %v1179_v25 = vsel %vm2902_vm2, %v2379_v13, %v1178_v4  ;;  %v2407_v29 = vld [vmem:[%s2900_s20 + $0x34] sm:$0xf] }
  0xcb   : > { %785 = vrot.lane.b32.xlu0 %v2324_v36, %s2794_s27  ;;  %v1061_v48 = vpop.permute.xlu1 %1060  ;;  %v1007_v36 = vsel %vm2924_vm5, %v1002_v24, %v3374_v40  ;;  %v1025_v38 = vor.u32 %v1024_v27, %v1021_v26  ;;  %v2371_v40 = vld [vmem:[%s2900_s20 + $0x58] sm:$0xf]  ;;  %v2383_v26 = vrot.slane %v2373_v17, 9  ;;  %v1460_v35 = vshrl.u32 %v2407_v29, 16  ;;  %v2411_v17 = vld [vmem:[%s2900_s20 + $0x44] sm:$0x1] }
  0xcc   : > { %1100 = vst.msk [vmem:[#allocation2 + $0x24] sm:$0xf] %vm1090_vm11, %v1061_v48  ;;  %v935_v48 = vsel %vm2924_vm5, %v930_v37, %v3390_v2  ;;  %v1199_v54 = vrot.slane %v2371_v40, 5  ;;  %v2419_v37 = vld [vmem:[%s2900_s20 + $0x64] sm:$0xf] }
  0xcd   : > { %v1059_v56 = vpop.permute.xlu0 %1058  ;;  %775 = vrot.lane.b32.xlu1 %v2319_v43, %s2794_s27  ;;  %v1040_v43 = vrot.slane %v1038_v34, 5  ;;  %v1026_v46 = vrot.slane %v1025_v38, 4  ;;  %v1552_v40 = vshll.u32 %v2419_v37, 16 }
  0xce   : > { %1099 = vst.msk [vmem:[#allocation2 + $0x20] sm:$0xf] %vm1090_vm11, %v1059_v56  ;;  %v2372_v56 = vld [vmem:[%s2900_s20 + $0x5c] sm:$0x1]  ;;  %v1201_v2 = vrot.slane %v1199_v54, 4 }
  0xcf   : > { %773 = vrot.lane.b32.xlu0 %v2318_v52, %s2794_s27  ;;  %v1049_v5 = vpop.permute.xlu1 %1048  ;;  %v1041_v51 = vsel %vm2924_vm5, %v1036_v42, %v1040_v43  ;;  %v1173_v52 = vrot.slane %v1171_v44, 4  ;;  %v1031_v58 = vsel %vm2924_vm5, %v1026_v46, %v3400_v19  ;;  %v1202_v1 = vrot.slane %v2372_v56, 5  ;;  %v2388_v42 = vld [vmem:[%s2900_s20 + $0x30] sm:$0xf]  ;;  %v2418_v43 = vld [vmem:[%s2900_s20 + $0x60] sm:$0xf] }
  0xd0   : > { %1094 = vst.msk [vmem:[#allocation2 + $0xc] sm:$0xf] %vm1090_vm11, %v1049_v5  ;;  %v2363_v5 = vld [vmem:[%s2900_s20 + $0x38] sm:$0x1]  ;;  %v2397_v46 = vld [vmem:[%s2900_s20 + $0x64] sm:$0xf] }
  0xd1   : > { %v1047_v12 = vpop.permute.xlu0 %1046  ;;  %791 = vrot.lane.b32.xlu1 %v2327_v53, %s2794_s27  ;;  %v1174_v53 = vrot.slane %v2360_v47, 5  ;;  %v1203_v10 = vsel %vm2902_vm2, %v1201_v2, %v1202_v1  ;;  %v1462_v47 = vrot.slane %v1460_v35, 4  ;;  %v2396_v56 = vld [vmem:[%s2900_s20 + $0x60] sm:$0xf]  ;;  %v2420_v1 = vld [vmem:[%s2900_s20 + $0x68] sm:$0x1] }
  0xd2   : > { %1093 = vst.msk [vmem:[#allocation2 + $0x8] sm:$0xf] %vm1090_vm11, %v1047_v12  ;;  %v1181_v12 = vrot.slane %v2363_v5, 5  ;;  %v2391_v2 = vld [vmem:[%s2900_s20 + $0x40] sm:$0xf]  ;;  %v1562_v13 = vshll.u32 %v2420_v1, 16 }
  0xd3   : > { %789 = vrot.lane.b32.xlu0 %v2326_v7, %s2794_s27  ;;  %v1065_v20 = vpop.permute.xlu1 %1064  ;;  %v1175_v62 = vsel %vm2902_vm2, %v1173_v52, %v1174_v53  ;;  %v2382_v7 = vrot.slane %v2370_v63, 9  ;;  %v1543_v53 = vshrl.u32 %v2418_v43, 16  ;;  %s218_s27 = sand.u32 1, %s2766_s13  }
  0xd4   : > { %1102 = vst.msk [vmem:[#allocation2 + $0x2c] sm:$0xf] %vm1090_vm11, %v1065_v20  ;;  %v1182_v20 = vsel %vm2902_vm2, %v1180_v11, %v1181_v12  ;;  %v1564_v35 = vrot.slane %v1562_v13, 5  ;;  %s3731_s11 = scalar_lea.sflag [#allocation4], %s218_s27 }
  0xd5   : > { %v1063_v28 = vpop.permute.xlu0 %1062  ;;  %1052 = vrot.lane.b32.xlu1 %v921_v14, %s2795_s28  ;;  %v1206_v14 = vrot.slane %v2374_v6, 5  ;;  %v1200_v18 = vsel %vm2902_vm2, %v2382_v7, %v1199_v54  ;;  %v1546_v54 = vshll.u32 %v2418_v43, 16 }
  0xd6   : > { %1101 = vst.msk [vmem:[#allocation2 + $0x28] sm:$0xf] %vm1090_vm11, %v1063_v28 }
  0xd7   : > { %1050 = vrot.lane.b32.xlu0 %v911_v21, %s2795_s28  ;;  %v1214_v31 = vpop.permute.xlu1 %1213  ;;  %v1208_v21 = vrot.slane %v1206_v14, 4  ;;  %v1207_v33 = vsel %vm2902_vm2, %v2383_v26, %v1206_v14  ;;  %v1548_v7 = vrot.slane %v1546_v54, 5 }
  0xd8   : > { %1261 = vst.msk [vmem:[#allocation2 + $0x4] sm:$0xf] %vm1259_vm12, %v1214_v31  ;;  %v1456_v31 = vshll.u32 %v2407_v29, 16 }
  0xd9   : > { %v1212_v39 = vpop.permute.xlu0 %1211  ;;  %1068 = vrot.lane.b32.xlu1 %v1017_v30, %s2795_s28  ;;  %v1210_v28 = vsel %vm2902_vm2, %v1208_v21, %v1209_v22 }
  0xda   : > { %1260 = vst.msk [vmem:[#allocation2] sm:$0xf] %vm1259_vm12, %v1212_v39  ;;  %v1447_v39 = vshrl.u32 %v2406_v23, 16 }
  0xdb   : > { %1066 = vrot.lane.b32.xlu0 %v1007_v36, %s2795_s28  ;;  %v1230_v45 = vpop.permute.xlu1 %1229  ;;  %v2389_v36 = vld [vmem:[%s2900_s20 + $0x34] sm:$0xf] }
  0xdc   : > { %1269 = vst.msk [vmem:[#allocation2 + $0x24] sm:$0xf] %vm1259_vm12, %v1230_v45  ;;  %v3491_v45 = vrot.slane %v1456_v31, 5 }
  0xdd   : > { %v1228_v49 = vpop.permute.xlu0 %1227  ;;  %1056 = vrot.lane.b32.xlu1 %v945_v41, %s2795_s28  ;;  %v1450_v41 = vshll.u32 %v2406_v23, 16 }
  0xde   : > { %1268 = vst.msk [vmem:[#allocation2 + $0x20] sm:$0xf] %vm1259_vm12, %v1228_v49  ;;  %v2408_v49 = vld [vmem:[%s2900_s20 + $0x38] sm:$0x1] }
  0xdf   : > { %1054 = vrot.lane.b32.xlu0 %v935_v48, %s2795_s28  ;;  %v1218_v55 = vpop.permute.xlu1 %1217  ;;  %v1556_v48 = vshrl.u32 %v2419_v37, 16  ;;  %v1452_v52 = vrot.slane %v1450_v41, 5  ;;  %v1466_v60 = vshll.u32 %v2408_v49, 16 }
  0xe0   : > { %1263 = vst.msk [vmem:[#allocation2 + $0xc] sm:$0xf] %vm1259_vm12, %v1218_v55  ;;  %v2410_v55 = vld [vmem:[%s2900_s20 + $0x40] sm:$0xf] }
  0xe1   : > { %v1216_v61 = vpop.permute.xlu0 %1215  ;;  %1072 = vrot.lane.b32.xlu1 %v1041_v51, %s2795_s28  ;;  %v1449_v51 = vrot.slane %v1447_v39, 4  ;;  %v1558_v63 = vrot.slane %v1556_v48, 4  ;;  %v1480_v4 = vshll.u32 %v2410_v55, 16  ;;  %v1468_v16 = vrot.slane %v1466_v60, 5 }
  0xe2   : > { %1262 = vst.msk [vmem:[#allocation2 + $0x8] sm:$0xf] %vm1259_vm12, %v1216_v61  ;;  %v3502_v61 = vrot.slane %v1552_v40, 5 }
  0xe3   : > { %1070 = vrot.lane.b32.xlu0 %v1031_v58, %s2795_s28  ;;  %v1234_v59 = vpop.permute.xlu1 %1233  ;;  %v1463_v58 = vor.u32 %v1462_v47, %v3491_v45  ;;  %v1453_v6 = vor.u32 %v1452_v52, %v1449_v51  ;;  %s2302_s28 = sshll.u32 %s218_s27, 7 }
  0xe4   : > { %1271 = vst.msk [vmem:[#allocation2 + $0x2c] sm:$0xf] %vm1259_vm12, %v1234_v59  ;;  %v1484_v59 = vshrl.u32 %v2410_v55, 16  ;;  %v2431_v55 = vld [vmem:[%s2900_s20 + $0x34] sm:$0xf] }
  0xe5   : > { %v1232_v8 = vpop.permute.xlu0 %1231  ;;  %1221 = vrot.lane.b32.xlu1 %v1175_v62, %s2796_s29  ;;  %v2409_v62 = vld [vmem:[%s2900_s20 + $0x3c] sm:$0xf]  ;;  %v1454_v26 = vrot.slane %v1453_v6, 4  ;;  %v1719_v1 = vrot.slane %v2431_v55, 5 }
  0xe6   : > { %1270 = vst.msk [vmem:[#allocation2 + $0x28] sm:$0xf] %vm1259_vm12, %v1232_v8  ;;  %v2422_v8 = vld [vmem:[%s2900_s20 + $0x70] sm:$0xf]  ;;  %v1471_v11 = vshrl.u32 %v2409_v62, 16  ;;  %v1474_v12 = vshll.u32 %v2409_v62, 16 }
  0xe7   : > { %1219 = vrot.lane.b32.xlu0 %v1172_v3, %s2796_s29  ;;  %v1312_v15 = vpop.permute.xlu1 %1311  ;;  %v1545_v3 = vrot.slane %v1543_v53, 4  ;;  %v1486_v21 = vrot.slane %v1484_v59, 4  ;;  %v1576_v22 = vshll.u32 %v2422_v8, 16  ;;  %v1459_v43 = vsel %vm2924_vm5, %v1454_v26, %v3491_v45  ;;  %v2432_v59 = vld [vmem:[%s2900_s20 + $0x38] sm:$0x1] }
  0xe8   : > { %1359 = vst.msk [vmem:[#allocation2 + $0x4] sm:$0xf] %vm1357_vm13, %v1312_v15  ;;  %v1464_v15 = vrot.slane %v1463_v58, 4  ;;  %v1473_v29 = vrot.slane %v1471_v11, 4  ;;  %v2446_v26 = vld [vmem:[%s2900_s20 + $0x70] sm:$0xf] }
  0xe9   : > { %v1310_v19 = vpop.permute.xlu0 %1309  ;;  %1237 = vrot.lane.b32.xlu1 %v1203_v10, %s2796_s29  ;;  %v2399_v10 = vld [vmem:[%s2900_s20 + $0x70] sm:$0xf]  ;;  %v3528_v39 = vrot.slane %v1576_v22, 5 }
  0xea   : > { %1358 = vst.msk [vmem:[#allocation2] sm:$0xf] %vm1357_vm13, %v1310_v19  ;;  %v2421_v19 = vld [vmem:[%s2900_s20 + $0x6c] sm:$0xf]  ;;  %v1469_v31 = vsel %vm2924_vm5, %v1464_v15, %v1468_v16  ;;  %v2434_v15 = vld [vmem:[%s2900_s20 + $0x40] sm:$0xf] }
  0xeb   : > { %1235 = vrot.lane.b32.xlu0 %v1200_v18, %s2796_s29  ;;  %v1328_v24 = vpop.permute.xlu1 %1327  ;;  %v1559_v18 = vor.u32 %v1558_v63, %v3502_v61  ;;  %v1570_v23 = vshll.u32 %v2421_v19, 16 }
  0xec   : > { %1367 = vst.msk [vmem:[#allocation2 + $0x24] sm:$0xf] %vm1357_vm13, %v1328_v24  ;;  %v1580_v24 = vshrl.u32 %v2422_v8, 16 }
  0xed   : > { %v1326_v27 = vpop.permute.xlu0 %1325  ;;  %1225 = vrot.lane.b32.xlu1 %v1182_v20, %s2796_s29  ;;  %v3518_v20 = vrot.slane %v1480_v4, 5  ;;  %v1560_v37 = vrot.slane %v1559_v18, 4 }
  0xee   : > { %1366 = vst.msk [vmem:[#allocation2 + $0x20] sm:$0xf] %vm1357_vm13, %v1326_v27  ;;  %v1549_v27 = vor.u32 %v1548_v7, %v1545_v3  ;;  %v1582_v41 = vrot.slane %v1580_v24, 4  ;;  %v2430_v7 = vld [vmem:[%s2900_s20 + $0x30] sm:$0xe]  ;;  %v1726_v24 = vrot.slane %v2434_v15, 5 }
  0xef   : > { %1223 = vrot.lane.b32.xlu0 %v1179_v25, %s2796_s29  ;;  %v1316_v30 = vpop.permute.xlu1 %1315  ;;  %v1565_v51 = vsel %vm2924_vm5, %v1560_v37, %v1564_v35  ;;  %v2450_v18 = vrot.slane %v2430_v7, 9  ;;  %v1754_v35 = vrot.slane %v2446_v26, 5  ;;  %v2447_v37 = vld [vmem:[%s2900_s20 + $0x74] sm:$0x1] }
  0xf0   : > { %1361 = vst.msk [vmem:[#allocation2 + $0xc] sm:$0xf] %vm1357_vm13, %v1316_v30  ;;  %v1476_v30 = vrot.slane %v1474_v12, 5  ;;  %v1550_v47 = vrot.slane %v1549_v27, 4  ;;  %v1583_v45 = vor.u32 %v1582_v41, %v3528_v39 }
  0xf1   : > { %v1314_v34 = vpop.permute.xlu0 %1313  ;;  %1241 = vrot.lane.b32.xlu1 %v1210_v28, %s2796_s29  ;;  %v2398_v28 = vld [vmem:[%s2900_s20 + $0x6c] sm:$0xf]  ;;  %v1720_v27 = vsel %vm2902_vm2, %v2450_v18, %v1719_v1 }
  0xf2   : > { %1360 = vst.msk [vmem:[#allocation2 + $0x8] sm:$0xf] %vm1357_vm13, %v1314_v34  ;;  %v1477_v40 = vor.u32 %v1476_v30, %v1473_v29  ;;  %v1584_v62 = vrot.slane %v1583_v45, 4 }
  0xf3   : > { %1239 = vrot.lane.b32.xlu0 %v1207_v33, %s2796_s29  ;;  %v1332_v38 = vpop.permute.xlu1 %1331  ;;  %v1567_v33 = vshrl.u32 %v2421_v19, 16  ;;  %s3693_s29 = scalar_lea.vmem [#allocation3], %s2302_s28 }
  0xf4   : > { %1369 = vst.msk [vmem:[#allocation2 + $0x2c] sm:$0xf] %vm1357_vm13, %v1332_v38  ;;  %v1487_v38 = vor.u32 %v1486_v21, %v3518_v20 }
  0xf5   : > { %v1330_v44 = vpop.permute.xlu0 %1329  ;;  %1319 = vrot.lane.b32.xlu1 %v2389_v36, %s2797_s4  ;;  %v1490_v36 = vshll.u32 %v2411_v17, 16  ;;  %v1569_v48 = vrot.slane %v1567_v33, 4  ;;  %v2442_v17 = vld [vmem:[%s2900_s20 + $0x60] sm:$0xe]  ;;  %v2433_v33 = vld [vmem:[%s2900_s20 + $0x3c] sm:$0xe] }
  0xf6   : > { %1368 = vst.msk [vmem:[#allocation2 + $0x28] sm:$0xf] %vm1357_vm13, %v1330_v44  ;;  %v2423_v44 = vld [vmem:[%s2900_s20 + $0x74] sm:$0x1]  ;;  %v1488_v52 = vrot.slane %v1487_v38, 4 }
  0xf7   : > { %1317 = vrot.lane.b32.xlu0 %v2388_v42, %s2797_s4  ;;  %v1593_v50 = vpop.permute.xlu1 %1592  ;;  %v1586_v53 = vshll.u32 %v2423_v44, 16  ;;  %v1756_v44 = vrot.slane %v1754_v35, 4 }
  0xf8   : > { %1640 = vst.msk [vmem:[#allocation2 + $0x4] sm:$0xf] %vm1638_vm14, %v1593_v50  ;;  %v1492_v50 = vrot.slane %v1490_v36, 5 }
  0xf9   : > { %v1591_v57 = vpop.permute.xlu0 %1590  ;;  %1335 = vrot.lane.b32.xlu1 %v2397_v46, %s2797_s4  ;;  %v1572_v46 = vrot.slane %v1570_v23, 5 }
  0xfa   : > { %1639 = vst.msk [vmem:[#allocation2] sm:$0xf] %vm1638_vm14, %v1591_v57  ;;  %v1478_v57 = vrot.slane %v1477_v40, 4  ;;  %v1493_v63 = vsel %vm2924_vm5, %v1488_v52, %v1492_v50 }
  0xfb   : > { %1333 = vrot.lane.b32.xlu0 %v2396_v56, %s2797_s4  ;;  %v1609_v5 = vpop.permute.xlu1 %1608  ;;  %v1555_v56 = vsel %vm2924_vm5, %v1550_v47, %v3502_v61  ;;  %v1573_v58 = vor.u32 %v1572_v46, %v1569_v48  ;;  %v2443_v61 = vld [vmem:[%s2900_s20 + $0x64] sm:$0xf]  ;;  %v1757_v47 = vrot.slane %v2447_v37, 5 }
  0xfc   : > { %1648 = vst.msk [vmem:[#allocation2 + $0x24] sm:$0xf] %vm1638_vm14, %v1609_v5  ;;  %v1483_v5 = vsel %vm2924_vm5, %v1478_v57, %v3518_v20  ;;  %v1747_v11 = vrot.slane %v2443_v61, 5 }
  0xfd   : > { %v1607_v14 = vpop.permute.xlu0 %1606  ;;  %1323 = vrot.lane.b32.xlu1 %v2391_v2, %s2797_s4  ;;  %v1588_v2 = vrot.slane %v1586_v53, 5  ;;  %v1574_v6 = vrot.slane %v1573_v58, 4  ;;  %v1758_v50 = vsel %vm2902_vm2, %v1756_v44, %v1757_v47 }
  0xfe   : > { %1647 = vst.msk [vmem:[#allocation2 + $0x20] sm:$0xf] %vm1638_vm14, %v1607_v14  ;;  %v2444_v14 = vld [vmem:[%s2900_s20 + $0x68] sm:$0x1]  ;;  %v1749_v21 = vrot.slane %v1747_v11, 4 }
  0xff   : > { %1321 = vrot.lane.b32.xlu0 %v2390_v9, %s2797_s4  ;;  %v1597_v25 = vpop.permute.xlu1 %1596  ;;  %v1589_v8 = vsel %vm2924_vm5, %v1584_v62, %v1588_v2  ;;  %v1721_v9 = vrot.slane %v1719_v1, 4  ;;  %v1579_v16 = vsel %vm2924_vm5, %v1574_v6, %v3528_v39  ;;  %v1750_v22 = vrot.slane %v2444_v14, 5 }
 0x100   : > { %1642 = vst.msk [vmem:[#allocation2 + $0xc] sm:$0xf] %vm1638_vm14, %v1597_v25  ;;  %v2435_v25 = vld [vmem:[%s2900_s20 + $0x44] sm:$0x1]  ;;  %v2451_v39 = vrot.slane %v2433_v33, 9 }
 0x101   : > { %v1595_v34 = vpop.permute.xlu0 %1594  ;;  %1339 = vrot.lane.b32.xlu1 %v2399_v10, %s2797_s4  ;;  %v1722_v10 = vrot.slane %v2432_v59, 5  ;;  %v1751_v23 = vsel %vm2902_vm2, %v1749_v21, %v1750_v22 }
 0x102   : > { %1641 = vst.msk [vmem:[#allocation2 + $0x8] sm:$0xf] %vm1638_vm14, %v1595_v34  ;;  %v1728_v34 = vrot.slane %v1726_v24, 4  ;;  %v1727_v48 = vsel %vm2902_vm2, %v2451_v39, %v1726_v24 }
 0x103   : > { %1337 = vrot.lane.b32.xlu0 %v2398_v28, %s2797_s4  ;;  %v1613_v42 = vpop.permute.xlu1 %1612  ;;  %v1723_v20 = vsel %vm2902_vm2, %v1721_v9, %v1722_v10  ;;  %v2454_v28 = vrot.slane %v2442_v17, 9  ;;  %s2499_s4 = sshll.u32 %s2774_s15, 4 }
 0x104   : > { %1650 = vst.msk [vmem:[#allocation2 + $0x2c] sm:$0xf] %vm1638_vm14, %v1613_v42  ;;  %v2445_v42 = vld [vmem:[%s2900_s20 + $0x6c] sm:$0xe]  ;;  %s2800_s20 = smov [#allocation3]  }
 0x105   : > { %v1611_v49 = vpop.permute.xlu0 %1610  ;;  %1600 = vrot.lane.b32.xlu1 %v1469_v31, %s2798_s5  ;;  %v1729_v31 = vrot.slane %v2435_v25, 5  ;;  %v1748_v38 = vsel %vm2902_vm2, %v2454_v28, %v1747_v11  ;;  %v2455_v46 = vrot.slane %v2445_v42, 9  ;;  %s2702_s24 = sshll.u32 %s2800_s20, 4  ;;  %s2703_s24 = int_to_ptr.vmem [resolvable:$false] %s2702_s24 }
 0x106   : > { %1649 = vst.msk [vmem:[#allocation2 + $0x28] sm:$0xf] %vm1638_vm14, %v1611_v49  ;;  %s2704_s28 = scalar_lea.vmem %s2703_s24, 4096 }
 0x107   : > { %1598 = vrot.lane.b32.xlu0 %v1459_v43, %s2798_s5  ;;  %v1762_v54 = vpop.permute.xlu1 %1761  ;;  %v1730_v43 = vsel %vm2902_vm2, %v1728_v34, %v1729_v31  ;;  %v1755_v52 = vsel %vm2902_vm2, %v2455_v46, %v1754_v35 }
 0x108   : > { %1809 = vst.msk [vmem:[#allocation2 + $0x4] sm:$0xf] %vm1807_vm15, %v1762_v54 }
 0x109   : > { %v1760_v60 = vpop.permute.xlu0 %1759  ;;  %1616 = vrot.lane.b32.xlu1 %v1565_v51, %s2798_s5 }
 0x10a   : > { %1808 = vst.msk [vmem:[#allocation2] sm:$0xf] %vm1807_vm15, %v1760_v60 }
 0x10b   : > { %1614 = vrot.lane.b32.xlu0 %v1555_v56, %s2798_s5  ;;  %v1778_v4 = vpop.permute.xlu1 %1777 }
 0x10c   : > { %1817 = vst.msk [vmem:[#allocation2 + $0x24] sm:$0xf] %vm1807_vm15, %v1778_v4 }
 0x10d   : > { %v1776_v3 = vpop.permute.xlu0 %1775  ;;  %1604 = vrot.lane.b32.xlu1 %v1493_v63, %s2798_s5 }
 0x10e   : > { %1816 = vst.msk [vmem:[#allocation2 + $0x20] sm:$0xf] %vm1807_vm15, %v1776_v3 }
 0x10f   : > { %1602 = vrot.lane.b32.xlu0 %v1483_v5, %s2798_s5  ;;  %v502_v12 = vpop.permute.xlu1 %501 }
 0x110   : > { %545 = vst.msk [vmem:[#allocation2 + $0x14] sm:$0xf] %vm539_vm7, %v502_v12 }
 0x111   : > { %v500_v13 = vpop.permute.xlu0 %499  ;;  %1620 = vrot.lane.b32.xlu1 %v1589_v8, %s2798_s5  ;;  %v2623_v19 = vld [vmem:[#allocation2] sm:$0xff]  }
 0x112   : > { %544 = vst.msk [vmem:[#allocation2 + $0x10] sm:$0xf] %vm539_vm7, %v500_v13  ;;  %2517 = vmatprep.mubr.msk.bf16.mxu0 %vm1907_vm0, %v2623_v19 }
 0x113   : > { %1618 = vrot.lane.b32.xlu0 %v1579_v16, %s2798_s5  ;;  %v518_v32 = vpop.permute.xlu1 %517  ;;  %s2495_s5 = sshll.u32 %s2778_s16, 5  ;;  %s2179_s16 = sshll.u32 %s3693_s29, 4  ;;  %s3726_s16 = int_to_ptr.vmem [resolvable:$true] %s2179_s16 }
 0x114   : > { %553 = vst.msk [vmem:[#allocation2 + $0x34] sm:$0xf] %vm539_vm7, %v518_v32  ;;  %s2698_s7 = scalar_lea.vmem %s3726_s16, 2048  ;;  %p2705_p4 = scmp.lt.s32.totalorder %s3726_s16, %s2703_s24 }
 0x115   : > { %v516_v29 = vpop.permute.xlu0 %515  ;;  %1769 = vrot.lane.b32.xlu1 %v1723_v20, %s2799_s6  ;;  %v2625_v30 = vld [vmem:[#allocation2 + $0x20] sm:$0xff]   ;;  %p2699_p0 = scmp.ne.s32.totalorder %s3726_s16, %s2698_s7  ;;  %p2706_p5 = scmp.lt.s32.totalorder %s2704_s28, %s2698_s7 }
 0x116   : > { %552 = vst.msk [vmem:[#allocation2 + $0x30] sm:$0xf] %vm539_vm7, %v516_v29  ;;  %2525 = vmatprep.mubr.msk.bf16.mxu1 %vm1907_vm0, %v2625_v30 }
 0x117   : > { %1767 = vrot.lane.b32.xlu0 %v1720_v27, %s2799_s6  ;;  %v1766_v36 = vpop.permute.xlu1 %1765  ;;  %p2700_p1 = pnand %p2699_p0, %p2873_p3  ;;  %p2707_p6 = por %p2706_p5, %p2705_p4 }
 0x118   : > { %1811 = vst.msk [vmem:[#allocation2 + $0xc] sm:$0xf] %vm1807_vm15, %v1766_v36 }
 0x119   : > { %v1764_v41 = vpop.permute.xlu0 %1763  ;;  %1785 = vrot.lane.b32.xlu1 %v1751_v23, %s2799_s6  ;;  %p2701_p2 = pneg %p2700_p1 }
 0x11a   : > { %1810 = vst.msk [vmem:[#allocation2 + $0x8] sm:$0xf] %vm1807_vm15, %v1764_v41 }
 0x11b   : > { %1783 = vrot.lane.b32.xlu0 %v1748_v38, %s2799_s6  ;;  %v1782_v40 = vpop.permute.xlu1 %1781  ;;  %p2708_p7 = pnand %p2707_p6, %p2701_p2 }
 0x11c   : > { %1819 = vst.msk [vmem:[#allocation2 + $0x2c] sm:$0xf] %vm1807_vm15, %v1782_v40 }
 0x11d   : > { %v1780_v49 = vpop.permute.xlu0 %1779  ;;  %1773 = vrot.lane.b32.xlu1 %v1730_v43, %s2799_s6 }
 0x11e   : > { %1818 = vst.msk [vmem:[#allocation2 + $0x28] sm:$0xf] %vm1807_vm15, %v1780_v49 }
 0x11f   : > { %1771 = vrot.lane.b32.xlu0 %v1727_v48, %s2799_s6  ;;  %v506_v51 = vpop.permute.xlu1 %505 }
 0x120   : > { %547 = vst.msk [vmem:[#allocation2 + $0x1c] sm:$0xf] %vm539_vm7, %v506_v51 }
 0x121   : > { %v504_v45 = vpop.permute.xlu0 %503  ;;  %1789 = vrot.lane.b32.xlu1 %v1758_v50, %s2799_s6  ;;  %v2628_v53 = vld [vmem:[#allocation2 + $0x8] sm:$0xff]  }
 0x122   : > { %546 = vst.msk [vmem:[#allocation2 + $0x18] sm:$0xf] %vm539_vm7, %v504_v45  ;;  %2518 = vmatmul.mubr.msk.bf16.vlgmr.msra.gmra.mxu0 %vm1907_vm0, %v2628_v53  ;;  %v3680_v53 = vld [vmem:[%s3785_s2] ss:$0 sm:$0xff] }
 0x123   : > { %1787 = vrot.lane.b32.xlu0 %v1755_v52, %s2799_s6  ;;  %v522_v54 = vpop.permute.xlu1 %521  ;;  %s2176_s6 = sadd.s32 %s2499_s4, %s2495_s5 }
 0x124   : > { %555 = vst.msk [vmem:[#allocation2 + $0x3c] sm:$0xf] %vm539_vm7, %v522_v54  ;;  %s2496_s15 = sshll.u32 %s2176_s6, 7 }
 0x125   : > { %v520_v55 = vpop.permute.xlu0 %519  ;;  %v2629_v56 = vld [vmem:[#allocation2 + $0x28] sm:$0xff]   ;;  %s3723_s10 = scalar_lea.hbm %s3786_s3, %s2496_s15 }
 0x126   : > { %554 = vst.msk [vmem:[#allocation2 + $0x38] sm:$0xf] %vm539_vm7, %v520_v55  ;;  %2526 = vmatmul.mubr.msk.bf16.vlgmr.msra.gmra.mxu1 %vm1907_vm0, %v2629_v56 }
 0x127   : > { %v674_v0 = vpop.permute.xlu1 %673 }
 0x128   : > { %717 = vst.msk [vmem:[#allocation2 + $0x14] sm:$0xf] %vm711_vm8, %v674_v0 }
 0x129   : > { %v672_v57 = vpop.permute.xlu0 %671 }
 0x12a   : > { %716 = vst.msk [vmem:[#allocation2 + $0x10] sm:$0xf] %vm711_vm8, %v672_v57 }
 0x12b   : > { %v690_v58 = vpop.permute.xlu1 %689 }
 0x12c   : > { %725 = vst.msk [vmem:[#allocation2 + $0x34] sm:$0xf] %vm711_vm8, %v690_v58 }
 0x12d   : > { %v688_v60 = vpop.permute.xlu0 %687 }
 0x12e   : > { %724 = vst.msk [vmem:[#allocation2 + $0x30] sm:$0xf] %vm711_vm8, %v688_v60 }
 0x12f   : > { %v678_v63 = vpop.permute.xlu1 %677 }
 0x130   : > { %719 = vst.msk [vmem:[#allocation2 + $0x1c] sm:$0xf] %vm711_vm8, %v678_v63 }
 0x131   : > { %v676_v62 = vpop.permute.xlu0 %675 }
 0x132   : > { %718 = vst.msk [vmem:[#allocation2 + $0x18] sm:$0xf] %vm711_vm8, %v676_v62 }
 0x133   : > { %v694_v2 = vpop.permute.xlu1 %693 }
 0x134   : > { %727 = vst.msk [vmem:[#allocation2 + $0x3c] sm:$0xf] %vm711_vm8, %v694_v2 }
 0x135   : > { %v692_v1 = vpop.permute.xlu0 %691 }
 0x136   : > { %726 = vst.msk [vmem:[#allocation2 + $0x38] sm:$0xf] %vm711_vm8, %v692_v1 }
 0x137   : > { %v772_v4 = vpop.permute.xlu1 %771 }
 0x138   : > { %815 = vst.msk [vmem:[#allocation2 + $0x14] sm:$0xf] %vm809_vm10, %v772_v4 }
 0x139   : > { %v770_v59 = vpop.permute.xlu0 %769 }
 0x13a   : > { %814 = vst.msk [vmem:[#allocation2 + $0x10] sm:$0xf] %vm809_vm10, %v770_v59 }
 0x13b   : > { %v788_v61 = vpop.permute.xlu1 %787 }
 0x13c   : > { %823 = vst.msk [vmem:[#allocation2 + $0x34] sm:$0xf] %vm809_vm10, %v788_v61 }
 0x13d   : > { %v786_v5 = vpop.permute.xlu0 %785 }
 0x13e   : > { %822 = vst.msk [vmem:[#allocation2 + $0x30] sm:$0xf] %vm809_vm10, %v786_v5 }
 0x13f   : > { %v776_v6 = vpop.permute.xlu1 %775 }
 0x140   : > { %817 = vst.msk [vmem:[#allocation2 + $0x1c] sm:$0xf] %vm809_vm10, %v776_v6 }
 0x141   : > { %v774_v3 = vpop.permute.xlu0 %773 }
 0x142   : > { %816 = vst.msk [vmem:[#allocation2 + $0x18] sm:$0xf] %vm809_vm10, %v774_v3 }
 0x143   : > { %v792_v7 = vpop.permute.xlu1 %791 }
 0x144   : > { %825 = vst.msk [vmem:[#allocation2 + $0x3c] sm:$0xf] %vm809_vm10, %v792_v7 }
 0x145   : > { %v790_v8 = vpop.permute.xlu0 %789 }
 0x146   : > { %824 = vst.msk [vmem:[#allocation2 + $0x38] sm:$0xf] %vm809_vm10, %v790_v8 }
 0x147   : > { %v1053_v9 = vpop.permute.xlu1 %1052 }
 0x148   : > { %1096 = vst.msk [vmem:[#allocation2 + $0x14] sm:$0xf] %vm1090_vm11, %v1053_v9 }
 0x149   : > { %v1051_v10 = vpop.permute.xlu0 %1050 }
 0x14a   : > { %1095 = vst.msk [vmem:[#allocation2 + $0x10] sm:$0xf] %vm1090_vm11, %v1051_v10 }
 0x14b   : > { %v1069_v11 = vpop.permute.xlu1 %1068 }
 0x14c   : > { %1104 = vst.msk [vmem:[#allocation2 + $0x34] sm:$0xf] %vm1090_vm11, %v1069_v11 }
 0x14d   : > { %v1067_v12 = vpop.permute.xlu0 %1066 }
 0x14e   : > { %1103 = vst.msk [vmem:[#allocation2 + $0x30] sm:$0xf] %vm1090_vm11, %v1067_v12 }
 0x14f   : > { %v1057_v14 = vpop.permute.xlu1 %1056 }
 0x150   : > { %1098 = vst.msk [vmem:[#allocation2 + $0x1c] sm:$0xf] %vm1090_vm11, %v1057_v14 }
 0x151   : > { %v1055_v15 = vpop.permute.xlu0 %1054 }
 0x152   : > { %1097 = vst.msk [vmem:[#allocation2 + $0x18] sm:$0xf] %vm1090_vm11, %v1055_v15 }
 0x153   : > { %v1073_v16 = vpop.permute.xlu1 %1072 }
 0x154   : > { %1106 = vst.msk [vmem:[#allocation2 + $0x3c] sm:$0xf] %vm1090_vm11, %v1073_v16 }
 0x155   : > { %v1071_v18 = vpop.permute.xlu0 %1070 }
 0x156   : > { %1105 = vst.msk [vmem:[#allocation2 + $0x38] sm:$0xf] %vm1090_vm11, %v1071_v18 }
 0x157   : > { %v1222_v13 = vpop.permute.xlu1 %1221 }
 0x158   : > { %1265 = vst.msk [vmem:[#allocation2 + $0x14] sm:$0xf] %vm1259_vm12, %v1222_v13 }
 0x159   : > { %v1220_v19 = vpop.permute.xlu0 %1219 }
 0x15a   : > { %1264 = vst.msk [vmem:[#allocation2 + $0x10] sm:$0xf] %vm1259_vm12, %v1220_v19 }
 0x15b   : > { %v1238_v17 = vpop.permute.xlu1 %1237 }
 0x15c   : > { %1273 = vst.msk [vmem:[#allocation2 + $0x34] sm:$0xf] %vm1259_vm12, %v1238_v17 }
 0x15d   : > { %v1236_v20 = vpop.permute.xlu0 %1235 }
 0x15e   : > { %1272 = vst.msk [vmem:[#allocation2 + $0x30] sm:$0xf] %vm1259_vm12, %v1236_v20 }
 0x15f   : > { %v1226_v21 = vpop.permute.xlu1 %1225 }
 0x160   : > { %1267 = vst.msk [vmem:[#allocation2 + $0x1c] sm:$0xf] %vm1259_vm12, %v1226_v21 }
 0x161   : > { %v1224_v22 = vpop.permute.xlu0 %1223 }
 0x162   : > { %1266 = vst.msk [vmem:[#allocation2 + $0x18] sm:$0xf] %vm1259_vm12, %v1224_v22 }
 0x163   : > { %v1242_v24 = vpop.permute.xlu1 %1241 }
 0x164   : > { %1275 = vst.msk [vmem:[#allocation2 + $0x3c] sm:$0xf] %vm1259_vm12, %v1242_v24 }
 0x165   : > { %v1240_v32 = vpop.permute.xlu0 %1239 }
 0x166   : > { %1274 = vst.msk [vmem:[#allocation2 + $0x38] sm:$0xf] %vm1259_vm12, %v1240_v32 }
 0x167   : > { %v1320_v25 = vpop.permute.xlu1 %1319 }
 0x168   : > { %1363 = vst.msk [vmem:[#allocation2 + $0x14] sm:$0xf] %vm1357_vm13, %v1320_v25 }
 0x169   : > { %v1318_v26 = vpop.permute.xlu0 %1317 }
 0x16a   : > { %1362 = vst.msk [vmem:[#allocation2 + $0x10] sm:$0xf] %vm1357_vm13, %v1318_v26 }
 0x16b   : > { %v1336_v27 = vpop.permute.xlu1 %1335 }
 0x16c   : > { %1371 = vst.msk [vmem:[#allocation2 + $0x34] sm:$0xf] %vm1357_vm13, %v1336_v27 }
 0x16d   : > { %v1334_v28 = vpop.permute.xlu0 %1333 }
 0x16e   : > { %1370 = vst.msk [vmem:[#allocation2 + $0x30] sm:$0xf] %vm1357_vm13, %v1334_v28 }
 0x16f   : > { %v1324_v29 = vpop.permute.xlu1 %1323 }
 0x170   : > { %1365 = vst.msk [vmem:[#allocation2 + $0x1c] sm:$0xf] %vm1357_vm13, %v1324_v29 }
 0x171   : > { %v1322_v30 = vpop.permute.xlu0 %1321 }
 0x172   : > { %1364 = vst.msk [vmem:[#allocation2 + $0x18] sm:$0xf] %vm1357_vm13, %v1322_v30 }
 0x173   : > { %v1340_v33 = vpop.permute.xlu1 %1339 }
 0x174   : > { %1373 = vst.msk [vmem:[#allocation2 + $0x3c] sm:$0xf] %vm1357_vm13, %v1340_v33 }
 0x175   : > { %v1338_v23 = vpop.permute.xlu0 %1337 }
 0x176   : > { %1372 = vst.msk [vmem:[#allocation2 + $0x38] sm:$0xf] %vm1357_vm13, %v1338_v23 }
 0x177   : > { %v1601_v34 = vpop.permute.xlu1 %1600 }
 0x178   : > { %1644 = vst.msk [vmem:[#allocation2 + $0x14] sm:$0xf] %vm1638_vm14, %v1601_v34 }
 0x179   : > { %v1599_v31 = vpop.permute.xlu0 %1598 }
 0x17a   : > { %1643 = vst.msk [vmem:[#allocation2 + $0x10] sm:$0xf] %vm1638_vm14, %v1599_v31 }
 0x17b   : > { %v1617_v35 = vpop.permute.xlu1 %1616 }
 0x17c   : > { %1652 = vst.msk [vmem:[#allocation2 + $0x34] sm:$0xf] %vm1638_vm14, %v1617_v35 }
 0x17d   : > { %v1615_v36 = vpop.permute.xlu0 %1614 }
 0x17e   : > { %1651 = vst.msk [vmem:[#allocation2 + $0x30] sm:$0xf] %vm1638_vm14, %v1615_v36 }
 0x17f   : > { %v1605_v37 = vpop.permute.xlu1 %1604 }
 0x180   : > { %1646 = vst.msk [vmem:[#allocation2 + $0x1c] sm:$0xf] %vm1638_vm14, %v1605_v37 }
 0x181   : > { %v1603_v38 = vpop.permute.xlu0 %1602 }
 0x182   : > { %1645 = vst.msk [vmem:[#allocation2 + $0x18] sm:$0xf] %vm1638_vm14, %v1603_v38 }
 0x183   : > { %v1621_v39 = vpop.permute.xlu1 %1620 }
 0x184   : > { %1654 = vst.msk [vmem:[#allocation2 + $0x3c] sm:$0xf] %vm1638_vm14, %v1621_v39 }
 0x185   : > { %v1619_v41 = vpop.permute.xlu0 %1618 }
 0x186   : > { %1653 = vst.msk [vmem:[#allocation2 + $0x38] sm:$0xf] %vm1638_vm14, %v1619_v41 }
 0x187   : > { %v1770_v42 = vpop.permute.xlu1 %1769 }
 0x188   : > { %1813 = vst.msk [vmem:[#allocation2 + $0x14] sm:$0xf] %vm1807_vm15, %v1770_v42 }
 0x189   : > { %v1768_v43 = vpop.permute.xlu0 %1767 }
 0x18a   : > { %1812 = vst.msk [vmem:[#allocation2 + $0x10] sm:$0xf] %vm1807_vm15, %v1768_v43 }
 0x18b   : > { %v1786_v44 = vpop.permute.xlu1 %1785 }
 0x18c   : > { %1821 = vst.msk [vmem:[#allocation2 + $0x34] sm:$0xf] %vm1807_vm15, %v1786_v44 }
 0x18d   : > { %v1784_v47 = vpop.permute.xlu0 %1783 }
 0x18e   : > { %1820 = vst.msk [vmem:[#allocation2 + $0x30] sm:$0xf] %vm1807_vm15, %v1784_v47 }
 0x18f   : > { %v1774_v40 = vpop.permute.xlu1 %1773 }
 0x190   : > { %1815 = vst.msk [vmem:[#allocation2 + $0x1c] sm:$0xf] %vm1807_vm15, %v1774_v40 }
 0x191   : > { %v1772_v48 = vpop.permute.xlu0 %1771  ;;  %v2630_v46 = vld [vmem:[#allocation2 + $0x10] sm:$0xff]  }
 0x192   : > { %1814 = vst.msk [vmem:[#allocation2 + $0x18] sm:$0xf] %vm1807_vm15, %v1772_v48  ;;  %2521 = vmatprep.mubr.msk.bf16.mxu0 %vm1907_vm0, %v2630_v46 }
 0x193   : > { %v1790_v49 = vpop.permute.xlu1 %1789 }
 0x194   : > { %1823 = vst.msk [vmem:[#allocation2 + $0x3c] sm:$0xf] %vm1807_vm15, %v1790_v49 }
 0x195   : > { %v1788_v50 = vpop.permute.xlu0 %1787  ;;  %v2631_v51 = vld [vmem:[#allocation2 + $0x30] sm:$0xff]  }
 0x196   : > { %1822 = vst.msk [vmem:[#allocation2 + $0x38] sm:$0xf] %vm1807_vm15, %v1788_v50  ;;  %2529 = vmatprep.mubr.msk.bf16.mxu1 %vm1907_vm0, %v2631_v51 }
 0x199   : > { %v2632_v52 = vld [vmem:[#allocation2 + $0x18] sm:$0xff]  }
 0x19a   : > { %2522 = vmatmul.mubr.msk.bf16.gmra.mxu0 %vm1907_vm0, %v2632_v52 }
 0x19d   : > { %v2633_v45 = vld [vmem:[#allocation2 + $0x38] sm:$0xff]  }
 0x19e   : > { %2530 = vmatmul.mubr.msk.bf16.gmra.mxu1 %vm1907_vm0, %v2633_v45 }
 0x1e2   : > { %v2519_v54 = vpop.f32.mrf.mxu0 }
 0x1e3   : > { %v1979_v55 = vadd.f32 %v2519_v54, %v3680_v53 }
 0x1e4   : > { %v1970_v56 = vpop.f32.mrf.mxu0 }
 0x1e5   : > { %v2478_v0 = vmul.f32 -1.442695, %v1979_v55  ;;  %v1971_v57 = vadd.f32 %v3680_v53, %v1970_v56 }
 0x1e6   : > { %v2520_v58 = vpop.f32.mrf.mxu0  ;;  %v2527_v60 = vpop.f32.mrf.mxu1 }
 0x1e7   : > { %2634 = vpow2.f32 %v2478_v0  ;;  %v2476_v63 = vmul.f32 -1.442695, %v1971_v57  ;;  %v1982_v62 = vadd.f32 %v2520_v58, %v3680_v53  ;;  %v2011_v2 = vadd.f32 %v2527_v60, %v3680_v53 }
 0x1e8   : > { %v1973_v1 = vpop.f32.mrf.mxu0  ;;  %v2002_v4 = vpop.f32.mrf.mxu1 }
 0x1e9   : > { %2636 = vpow2.f32 %v2476_v63  ;;  %v2479_v59 = vmul.f32 -1.442695, %v1982_v62  ;;  %v2486_v61 = vmul.f32 -1.442695, %v2011_v2  ;;  %v1974_v5 = vadd.f32 %v3680_v53, %v1973_v1 }
 0x1ea   : > { %v2003_v6 = vadd.f32 %v3680_v53, %v2002_v4  ;;  %v2528_v3 = vpop.f32.mrf.mxu1 }
 0x1eb   : > { %2638 = vpow2.f32 %v2479_v59  ;;  %v2477_v7 = vmul.f32 -1.442695, %v1974_v5  ;;  %v2014_v8 = vadd.f32 %v2528_v3, %v3680_v53 }
 0x1ec   : > { %2640 = vpow2.f32 %v2486_v61  ;;  %v2484_v9 = vmul.f32 -1.442695, %v2003_v6  ;;  %v2005_v10 = vpop.f32.mrf.mxu1 }
 0x1ed   : > { %2642 = vpow2.f32 %v2477_v7  ;;  %v2487_v11 = vmul.f32 -1.442695, %v2014_v8  ;;  %v2006_v12 = vadd.f32 %v3680_v53, %v2005_v10 }
 0x1ee   : > { %2644 = vpow2.f32 %v2484_v9 }
 0x1ef   : > { %2646 = vpow2.f32 %v2487_v11  ;;  %v2485_v14 = vmul.f32 -1.442695, %v2006_v12 }
 0x1f1   : > { %2648 = vpow2.f32 %v2485_v14 }
 0x1f4   : > { %v2635_v15 = vpop.eup %2634 }
 0x1f5   : > { %v2083_v16 = vadd.f32 1.0, %v2635_v15 }
 0x1f6   : > { %v2637_v18 = vpop.eup %2636 }
 0x1f7   : > { %2650 = vrcp.f32 %v2083_v16  ;;  %v2081_v13 = vadd.f32 1.0, %v2637_v18 }
 0x1f8   : > { %v2639_v19 = vpop.eup %2638 }
 0x1f9   : > { %v2641_v17 = vpop.eup %2640  ;;  %2652 = vrcp.f32 %v2081_v13  ;;  %v2084_v20 = vadd.f32 1.0, %v2639_v19 }
 0x1fa   : > { %v2643_v21 = vpop.eup %2642  ;;  %v2091_v22 = vadd.f32 1.0, %v2641_v17 }
 0x1fb   : > { %v2645_v24 = vpop.eup %2644  ;;  %2654 = vrcp.f32 %v2084_v20  ;;  %v2082_v32 = vadd.f32 1.0, %v2643_v21 }
 0x1fc   : > { %v2647_v25 = vpop.eup %2646  ;;  %2656 = vrcp.f32 %v2091_v22  ;;  %v2089_v26 = vadd.f32 1.0, %v2645_v24 }
 0x1fd   : > { %2658 = vrcp.f32 %v2082_v32  ;;  %v2092_v27 = vadd.f32 1.0, %v2647_v25 }
 0x1fe   : > { %v2649_v28 = vpop.eup %2648  ;;  %2660 = vrcp.f32 %v2089_v26 }
 0x1ff   : > { %2662 = vrcp.f32 %v2092_v27  ;;  %v2090_v29 = vadd.f32 1.0, %v2649_v28 }
 0x201   : > { %2664 = vrcp.f32 %v2090_v29 }
 0x204   : > { %v2651_v30 = vpop.eup %2650 }
 0x205   : > { %v2131_v33 = vmul.f32 %v2651_v30, %v1979_v55 }
 0x206   : > { %v2653_v23 = vpop.eup %2652 }
 0x207   : > { %2147 = vst [vmem:[%s3693_s29 + $0x10] sm:$0xff] %v2131_v33  ;;  %v2129_v34 = vmul.f32 %v2653_v23, %v1971_v57 }
 0x208   : > { %v2655_v31 = vpop.eup %2654 }
 0x209   : > { %v2657_v35 = vpop.eup %2656  ;;  %2145 = vst [vmem:[%s3693_s29] sm:$0xff] %v2129_v34  ;;  %v2132_v36 = vmul.f32 %v2655_v31, %v1982_v62 }
 0x20a   : > { %v2659_v37 = vpop.eup %2658  ;;  %v2139_v38 = vmul.f32 %v2657_v35, %v2011_v2 }
 0x20b   : > { %v2661_v39 = vpop.eup %2660  ;;  %2148 = vst [vmem:[%s3693_s29 + $0x18] sm:$0xff] %v2132_v36  ;;  %v2130_v41 = vmul.f32 %v2659_v37, %v1974_v5 }
 0x20c   : > { %v2663_v42 = vpop.eup %2662  ;;  %2155 = vst [vmem:[%s3693_s29 + $0x50] sm:$0xff] %v2139_v38  ;;  %v2137_v43 = vmul.f32 %v2661_v39, %v2003_v6 }
 0x20d   : > { %2146 = vst [vmem:[%s3693_s29 + $0x8] sm:$0xff] %v2130_v41  ;;  %v2140_v44 = vmul.f32 %v2663_v42, %v2014_v8 }
 0x20e   : > { %v2665_v47 = vpop.eup %2664  ;;  %2153 = vst [vmem:[%s3693_s29 + $0x40] sm:$0xff] %v2137_v43 }
 0x20f   : > { %2156 = vst [vmem:[%s3693_s29 + $0x58] sm:$0xff] %v2140_v44  ;;  %v2138_v40 = vmul.f32 %v2665_v47, %v2006_v12 }
 0x211   : > { %2154 = vst [vmem:[%s3693_s29 + $0x48] sm:$0xff] %v2138_v40 }
 0x25a   : > { %v2523_v48 = vpop.f32.mrf.mxu0 }
 0x25b   : > { %v1995_v46 = vadd.f32 %v2523_v48, %v3680_v53 }
 0x25c   : > { %v1986_v49 = vpop.f32.mrf.mxu0 }
 0x25d   : > { %v2482_v50 = vmul.f32 -1.442695, %v1995_v46  ;;  %v1987_v51 = vadd.f32 %v3680_v53, %v1986_v49 }
 0x25e   : > { %v2524_v52 = vpop.f32.mrf.mxu0  ;;  %v2531_v45 = vpop.f32.mrf.mxu1 }
 0x25f   : > { %2666 = vpow2.f32 %v2482_v50  ;;  %v2480_v54 = vmul.f32 -1.442695, %v1987_v51  ;;  %v1998_v55 = vadd.f32 %v2524_v52, %v3680_v53  ;;  %v2027_v56 = vadd.f32 %v2531_v45, %v3680_v53 }
 0x260   : > { %v1989_v0 = vpop.f32.mrf.mxu0  ;;  %v2018_v57 = vpop.f32.mrf.mxu1 }
 0x261   : > { %2668 = vpow2.f32 %v2480_v54  ;;  %v2483_v58 = vmul.f32 -1.442695, %v1998_v55  ;;  %v2490_v60 = vmul.f32 -1.442695, %v2027_v56  ;;  %v1990_v63 = vadd.f32 %v3680_v53, %v1989_v0 }
 0x262   : > { %v2019_v62 = vadd.f32 %v3680_v53, %v2018_v57  ;;  %v2532_v2 = vpop.f32.mrf.mxu1 }
 0x263   : > { %2670 = vpow2.f32 %v2483_v58  ;;  %v2481_v1 = vmul.f32 -1.442695, %v1990_v63  ;;  %v2030_v4 = vadd.f32 %v2532_v2, %v3680_v53 }
 0x264   : > { %2672 = vpow2.f32 %v2490_v60  ;;  %v2488_v59 = vmul.f32 -1.442695, %v2019_v62  ;;  %v2021_v61 = vpop.f32.mrf.mxu1 }
 0x265   : > { %2674 = vpow2.f32 %v2481_v1  ;;  %v2491_v5 = vmul.f32 -1.442695, %v2030_v4  ;;  %v2022_v6 = vadd.f32 %v3680_v53, %v2021_v61 }
 0x266   : > { %2676 = vpow2.f32 %v2488_v59 }
 0x267   : > { %2678 = vpow2.f32 %v2491_v5  ;;  %v2489_v3 = vmul.f32 -1.442695, %v2022_v6 }
 0x269   : > { %2680 = vpow2.f32 %v2489_v3 }
 0x26c   : > { %v2667_v7 = vpop.eup %2666 }
 0x26d   : > { %v2087_v8 = vadd.f32 1.0, %v2667_v7 }
 0x26e   : > { %v2669_v9 = vpop.eup %2668 }
 0x26f   : > { %2682 = vrcp.f32 %v2087_v8  ;;  %v2085_v10 = vadd.f32 1.0, %v2669_v9 }
 0x270   : > { %v2671_v11 = vpop.eup %2670 }
 0x271   : > { %v2673_v12 = vpop.eup %2672  ;;  %2684 = vrcp.f32 %v2085_v10  ;;  %v2088_v14 = vadd.f32 1.0, %v2671_v11 }
 0x272   : > { %v2675_v15 = vpop.eup %2674  ;;  %v2095_v16 = vadd.f32 1.0, %v2673_v12 }
 0x273   : > { %v2677_v18 = vpop.eup %2676  ;;  %2686 = vrcp.f32 %v2088_v14  ;;  %v2086_v53 = vadd.f32 1.0, %v2675_v15 }
 0x274   : > { %v2679_v13 = vpop.eup %2678  ;;  %2688 = vrcp.f32 %v2095_v16  ;;  %v2093_v19 = vadd.f32 1.0, %v2677_v18 }
 0x275   : > { %2690 = vrcp.f32 %v2086_v53  ;;  %v2096_v17 = vadd.f32 1.0, %v2679_v13 }
 0x276   : > { %v2681_v20 = vpop.eup %2680  ;;  %2692 = vrcp.f32 %v2093_v19 }
 0x277   : > { %2694 = vrcp.f32 %v2096_v17  ;;  %v2094_v21 = vadd.f32 1.0, %v2681_v20 }
 0x279   : > { %2696 = vrcp.f32 %v2094_v21 }
 0x27c   : > { %v2683_v22 = vpop.eup %2682 }
 0x27d   : > { %v2135_v24 = vmul.f32 %v2683_v22, %v1995_v46 }
 0x27e   : > { %v2685_v32 = vpop.eup %2684 }
 0x27f   : > { %2151 = vst [vmem:[%s3693_s29 + $0x30] sm:$0xff] %v2135_v24  ;;  %v2133_v25 = vmul.f32 %v2685_v32, %v1987_v51 }
 0x280   : > { %v2687_v26 = vpop.eup %2686 }
 0x281   : > { %v2689_v27 = vpop.eup %2688  ;;  %2149 = vst [vmem:[%s3693_s29 + $0x20] sm:$0xff] %v2133_v25  ;;  %v2136_v28 = vmul.f32 %v2687_v26, %v1998_v55 }
 0x282   : > { %v2691_v29 = vpop.eup %2690  ;;  %v2143_v30 = vmul.f32 %v2689_v27, %v2027_v56 }
 0x283   : > { %v2693_v33 = vpop.eup %2692  ;;  %2152 = vst [vmem:[%s3693_s29 + $0x38] sm:$0xff] %v2136_v28  ;;  %v2134_v23 = vmul.f32 %v2691_v29, %v1990_v63 }
 0x284   : > { %v2695_v34 = vpop.eup %2694  ;;  %2159 = vst [vmem:[%s3693_s29 + $0x70] sm:$0xff] %v2143_v30  ;;  %v2141_v31 = vmul.f32 %v2693_v33, %v2019_v62 }
 0x285   : > { %2150 = vst [vmem:[%s3693_s29 + $0x28] sm:$0xff] %v2134_v23  ;;  %v2144_v35 = vmul.f32 %v2695_v34, %v2030_v4 }
 0x286   : > { %v2697_v36 = vpop.eup %2696  ;;  %2157 = vst [vmem:[%s3693_s29 + $0x60] sm:$0xff] %v2141_v31 }
 0x287   : > { %2160 = vst [vmem:[%s3693_s29 + $0x78] sm:$0xff] %v2144_v35  ;;  %v2142_v37 = vmul.f32 %v2697_v36, %v2022_v6 }
 0x289   : > { %2158 = vst [vmem:[%s3693_s29 + $0x68] sm:$0xff] %v2142_v37 }
 0x28a   : > { %2711 = shalt.err (!%p2708_p7)
}
 0x28b   : > { %s2712_s27 = scalar_lea.hbm %s3723_s10, 2048  ;;  %s2716_s5 = scalar_lea.hbm %s3786_s3, 8192 }
 0x28c   : > { %p2713_p9 = scmp.ne.s32.totalorder %s3723_s10, %s2712_s27  ;;  %p2717_p12 = scmp.lt.s32.totalorder %s3723_s10, %s3786_s3 }
 0x28d   : > { %p2718_p13 = scmp.lt.s32.totalorder %s2716_s5, %s2712_s27 }
 0x28e   : > { %p2714_p10 = pnand %p2713_p9, %p2873_p3 }
 0x28f   : > { %p2719_p0 = por %p2718_p13, %p2717_p12 }
 0x290   : > { %p2715_p11 = pneg %p2714_p10 }
 0x292   : > { %p2720_p1 = pnand %p2719_p0, %p2715_p11 }
 0x294   : > { %2723 = shalt.err (!%p2720_p1)
}
 0x295   : > { %s2801_s8 = smov 128  }
 0x296   : > { %2543 = dma.vmem_to_hbm [thread:$0]  (%p2873_p3), %s3726_s16, 2048, %s3723_s10, %s3731_s11, %s2801_s8, %s2801_s8, %s2792_s21  }
 0x297 PF: > { %p2549_p2 = scmp.ge.s32.totalorder %s2790_s19, 2  ;;  %s2194_s9 = sand.u32 1, %s2762_s12  }
 0x298   : > { %s2195_s7 = scalar_lea.sflag [#allocation4], %s2194_s9 }
 0x299   : > { %p2546_p4 = pnand %p2549_p2, %p2882_p8 }
 0x29b   : > { %p2547_p5 = pneg %p2546_p4 }
 0x29d   : > { %2757 = dma.done.wait (%p2547_p5), %s2195_s7, 2048  }
 0x29e   : > { %2759 = vsyncadd (%p2547_p5), %s2195_s7, 4294965248  ;;  %s16_s19 = sadd.s32 1, %s2790_s19   ;;  %s3793_s12 = smov %s2766_s13 }
 0x29f   : > { %p13_p6 = scmp.ge.s32.totalorder %s16_s19, 6   ;;  %s3794_s13 = smov %s2770_s14 }
 0x2a0   : > { %s3795_s14 = smov %s2891_s30  ;;  %s3796_s15 = smov %s2782_s17 }
 0x2a1   : > { %s3797_s16 = smov %s2786_s18  ;;  %s3798_s17 = smov %s3801_s22 }
 0x2a2   : > { %s3799_s18 = smov %s3805_s23  ;;  %15 = sbr.rel (!%p13_p6) target bundleno = 5 (0x5), region = 75 }
 0x2a7   :  { %2200 = vsyncpa [#allocation4], 1 }
 0x2a8   :  { %2202 = vsyncpa [#allocation4 + $0x1], 1 }

</bundles_post_ra>
